<compile_context>
chip_gen: v7x
topology: tpu7x:2x2x1
jax: 0.10.0
libtpu: 0.0.40
codegen_flags: <defaults>
</compile_context>

<pallas_src>
import jax
import jax.numpy as jnp
from jax import lax
from jax.experimental import pallas as pl
from jax.experimental.pallas import tpu as pltpu

LANE = 128


def _round_up(v, m):
    return ((v + m - 1) // m) * m


def _row_tile(h, requested):
    """Largest divisor of h that is <= requested (keeps row tiles exact)."""
    th = max(1, min(requested, h))
    while h % th:
        th -= 1
    return th


# -----------------------------------------------------------------------------
# Bilinear upsample (scale_factor=2, align_corners=True) — XLA glue.
# TODO(synk): fold the two interp matmuls into the first Pallas kernel to avoid
# one HBM round trip of the upsampled activation.
# -----------------------------------------------------------------------------
def _interp_matrix(n_in, n_out, dtype=jnp.float32):
    if n_in == 1:
        return jnp.ones((n_out, 1), dtype)
    pos = jnp.arange(n_out, dtype=dtype) * (float(n_in - 1) / float(n_out - 1))
    lo = jnp.clip(jnp.floor(pos).astype(jnp.int32), 0, n_in - 2)
    frac = pos - lo.astype(dtype)
    m = jnp.zeros((n_out, n_in), dtype)
    rows = jnp.arange(n_out)
    m = m.at[rows, lo].set(1.0 - frac)
    m = m.at[rows, lo + 1].add(frac)
    return m


def bilinear_up2(x_nhwc):
    n, h, w, c = x_nhwc.shape
    ah = _interp_matrix(h, 2 * h)
    aw = _interp_matrix(w, 2 * w)
    t = jnp.einsum('nhwc,yh->nywc', x_nhwc, ah)
    return jnp.einsum('nywc,xw->nyxc', t, aw)


# -----------------------------------------------------------------------------
# Kernel A: halo row-tiled 3x3 conv (+ optional per-channel affine / ReLU).
# -----------------------------------------------------------------------------
def conv3x3_halo(xpad, wmat, scale, bias, *, relu, tile_rows=8,
                 vmem_limit_bytes=None, out_dtype=jnp.float32):
    """xpad: (N, H+2, W+2, Cp) zero-padded, channel-padded input (compute dtype).
    wmat: (9*Cp, Coutp) 3x3 weights flattened in (dy, dx, cin) order.
    scale/bias: (1, Coutp) float32. Returns (N, H, W, Coutp) float32."""
    n, hp2, wp2, cp = xpad.shape
    h, w = hp2 - 2, wp2 - 2
    coutp = wmat.shape[-1]
    th = _row_tile(h, tile_rows)
    nt = h // th

    def kernel(x_hbm, w_ref, s_ref, b_ref, o_ref, buf, sem):
        b = pl.program_id(0)
        t = pl.program_id(1)
        nt_ = pl.num_programs(1)
        slot = t % 2

        def copy(bb, tt, sl):
            return pltpu.make_async_copy(
                x_hbm.at[bb, pl.ds(tt * th, th + 2)], buf.at[sl], sem.at[sl])

        @pl.when(t == 0)                 # first tile of this batch: no prefetch yet
        def _():
            copy(b, t, slot).start()

        @pl.when(t + 1 < nt_)            # prefetch next row tile (double buffer)
        def _():
            copy(b, t + 1, 1 - slot).start()

        copy(b, t, slot).wait()
        slab = buf[slot]                 # (th+2, w+2, cp)

        # One lane-dense matmul: (th*w, 9*cp) @ (9*cp, coutp), f32 accumulate.
        patches = jnp.concatenate(
            [slab[dy:dy + th, dx:dx + w, :].reshape(th * w, cp)
             for dy in range(3) for dx in range(3)], axis=-1)
        acc = jnp.dot(patches, w_ref[...], preferred_element_type=jnp.float32)
        out = acc * s_ref[...] + b_ref[...]
        if relu:
            out = jnp.maximum(out, 0.0)
        o_ref[0] = out.reshape(th, w, coutp).astype(o_ref.dtype)

    return pl.pallas_call(
        kernel,
        out_shape=jax.ShapeDtypeStruct((n, h, w, coutp), out_dtype),
        grid=(n, nt),
        in_specs=[
            pl.BlockSpec(memory_space=pl.ANY),                       # stays in HBM
            pl.BlockSpec((9 * cp, coutp), lambda b, t: (0, 0)),      # weights resident
            pl.BlockSpec((1, coutp), lambda b, t: (0, 0)),
            pl.BlockSpec((1, coutp), lambda b, t: (0, 0)),
        ],
        out_specs=pl.BlockSpec((1, th, w, coutp), lambda b, t: (b, t, 0, 0)),
        scratch_shapes=[
            pltpu.VMEM((2, th + 2, w + 2, cp), xpad.dtype),
            pltpu.SemaphoreType.DMA((2,)),
        ],
        compiler_params=pltpu.CompilerParams(
            dimension_semantics=("parallel", "arbitrary"),
            vmem_limit_bytes=vmem_limit_bytes),
    )(xpad, wmat, scale, bias)


# -----------------------------------------------------------------------------
# Kernel B: fused DoubleConv(down=False) + 1x1 residual, halo row-tiled.
#   out = relu(bn2(conv2(relu(bn1(conv1(cat)))))) + cat @ w_res
# -----------------------------------------------------------------------------
def double_conv_fused(catp, w1mat, s1, b1, w2mat, s2, b2, wres, *,
                      tile_rows=8, vmem_limit_bytes=None, out_dtype=jnp.float32):
    """catp: (N, H+4, W+2, Cp) cat zero-padded by 2 rows / 1 col, channel-padded."""
    n, hp4, wp2, cp = catp.shape
    h, w = hp4 - 4, wp2 - 2
    cmidp = w1mat.shape[-1]
    coutp = w2mat.shape[-1]
    cdt = catp.dtype
    th = _row_tile(h, tile_rows)
    nt = h // th

    def kernel(x_hbm, w1_ref, s1_ref, b1_ref, w2_ref, s2_ref, b2_ref, wr_ref,
               o_ref, buf, sem):
        b = pl.program_id(0)
        t = pl.program_id(1)
        nt_ = pl.num_programs(1)
        slot = t % 2

        def copy(bb, tt, sl):
            return pltpu.make_async_copy(
                x_hbm.at[bb, pl.ds(tt * th, th + 4)], buf.at[sl], sem.at[sl])

        @pl.when(t == 0)
        def _():
            copy(b, t, slot).start()

        @pl.when(t + 1 < nt_)
        def _():
            copy(b, t + 1, 1 - slot).start()

        copy(b, t, slot).wait()
        slab = buf[slot]                                   # (th+4, w+2, cp)

        # ---- conv1 + BN + ReLU over th+2 h1-rows (includes 1-row halo for conv2)
        p1 = jnp.concatenate(
            [slab[dy:dy + th + 2, dx:dx + w, :].reshape((th + 2) * w, cp)
             for dy in range(3) for dx in range(3)], axis=-1)
        h1 = jnp.dot(p1, w1_ref[...], preferred_element_type=jnp.float32)
        h1 = jnp.maximum(h1 * s1_ref[...] + b1_ref[...], 0.0)
        h1 = h1.reshape(th + 2, w, cmidp)

        # Halo rows outside the image act as conv2's zero padding.
        row0 = t * th - 1
        rows = lax.broadcasted_iota(jnp.int32, (th + 2, 1, 1), 0) + row0
        h1 = jnp.where((rows >= 0) & (rows < h), h1, 0.0)

        # Zero-pad W by one column each side for conv2; cast for the MXU.
        zcol = jnp.zeros((th + 2, 1, cmidp), h1.dtype)
        h1p = jnp.concatenate([zcol, h1, zcol], axis=1).astype(cdt)

        # ---- conv2 + BN + ReLU
        p2 = jnp.concatenate(
            [h1p[dy:dy + th, dx:dx + w, :].reshape(th * w, cmidp)
             for dy in range(3) for dx in range(3)], axis=-1)
        out = jnp.dot(p2, w2_ref[...], preferred_element_type=jnp.float32)
        out = jnp.maximum(out * s2_ref[...] + b2_ref[...], 0.0)

        # ---- 1x1 residual on the (unpadded) cat tile, already resident
        xres = slab[2:2 + th, 1:1 + w, :].reshape(th * w, cp)
        out = out + jnp.dot(xres, wr_ref[...], preferred_element_type=jnp.float32)

        o_ref[0] = out.reshape(th, w, coutp).astype(o_ref.dtype)

    return pl.pallas_call(
        kernel,
        out_shape=jax.ShapeDtypeStruct((n, h, w, coutp), out_dtype),
        grid=(n, nt),
        in_specs=[
            pl.BlockSpec(memory_space=pl.ANY),
            pl.BlockSpec((9 * cp, cmidp), lambda b, t: (0, 0)),
            pl.BlockSpec((1, cmidp), lambda b, t: (0, 0)),
            pl.BlockSpec((1, cmidp), lambda b, t: (0, 0)),
            pl.BlockSpec((9 * cmidp, coutp), lambda b, t: (0, 0)),
            pl.BlockSpec((1, coutp), lambda b, t: (0, 0)),
            pl.BlockSpec((1, coutp), lambda b, t: (0, 0)),
            pl.BlockSpec((cp, coutp), lambda b, t: (0, 0)),
        ],
        out_specs=pl.BlockSpec((1, th, w, coutp), lambda b, t: (b, t, 0, 0)),
        scratch_shapes=[
            pltpu.VMEM((2, th + 4, w + 2, cp), cdt),
            pltpu.SemaphoreType.DMA((2,)),
        ],
        compiler_params=pltpu.CompilerParams(
            dimension_semantics=("parallel", "arbitrary"),
            vmem_limit_bytes=vmem_limit_bytes),
    )(catp, w1mat, s1, b1, w2mat, s2, b2, wres)


# -----------------------------------------------------------------------------
# Parameters & full Up forward.
# -----------------------------------------------------------------------------
def bn_fold(gamma, beta, mean, var, eps=1e-5):
    scale = gamma / jnp.sqrt(var + eps)
    return scale, beta - mean * scale


def init_params(key, in_channels, out_channels):
    # pos_dim = in_channels - 2*out_channels must be 0 here (learnable_pos=None).
    assert in_channels == 2 * out_channels
    cmid = in_channels // 2
    ks = jax.random.split(key, 12)
    nrm = lambda k, s: (0.1 * jax.random.normal(k, s, jnp.float32))
    return {
        'w_up': nrm(ks[0], (3, 3, in_channels, out_channels)),
        'w1': nrm(ks[1], (3, 3, in_channels, cmid)),
        'bn1': (1.0 + nrm(ks[2], (cmid,)), nrm(ks[3], (cmid,)),
                nrm(ks[4], (cmid,)), 1.0 + jnp.abs(nrm(ks[5], (cmid,)))),
        'w2': nrm(ks[6], (3, 3, cmid, out_channels)),
        'bn2': (1.0 + nrm(ks[7], (out_channels,)), nrm(ks[8], (out_channels,)),
                nrm(ks[9], (out_channels,)), 1.0 + jnp.abs(nrm(ks[10], (out_channels,)))),
        'w_res': nrm(ks[11], (in_channels, out_channels)),
    }


def up_forward(x_nchw, xres_nchw, p, *, compute_dtype=jnp.bfloat16,
               tile_rows=8, vmem_limit_bytes=None):
    """TODO(synk): attention gate / learnable_pos branches not constructed
    (module defaults attention=False, learnable_pos=None)."""
    f32 = jnp.float32
    x = jnp.transpose(x_nchw, (0, 2, 3, 1)).astype(f32)
    xr = jnp.transpose(xres_nchw, (0, 2, 3, 1)).astype(f32)
    cin = x.shape[-1]
    cout = p['w_up'].shape[-1]
    cmid = p['w1'].shape[-1]
    ccat = xr.shape[-1] + cout

    cinp = _round_up(cin, LANE)
    coutp = _round_up(cout, LANE)
    cmidp = _round_up(cmid, LANE)
    ccatp = _round_up(ccat, LANE)

    # ---- upsample (XLA) + 3x3 upsample conv (Pallas) ----
    xu = bilinear_up2(x)                                            # (n, 2h, 2w, cin)
    xu_p = jnp.pad(xu, ((0, 0), (1, 1), (1, 1), (0, cinp - cin))).astype(compute_dtype)
    w_up = jnp.pad(p['w_up'], ((0, 0), (0, 0), (0, cinp - cin), (0, coutp - cout)))
    w_up = w_up.reshape(9 * cinp, coutp).astype(compute_dtype)
    yu = conv3x3_halo(xu_p, w_up,
                      jnp.ones((1, coutp), f32), jnp.zeros((1, coutp), f32),
                      relu=False, tile_rows=tile_rows,
                      vmem_limit_bytes=vmem_limit_bytes)[..., :cout]

    # ---- pad to x_res spatial size (F.pad order), concat along channels ----
    dy = xr.shape[1] - yu.shape[1]
    dx = xr.shape[2] - yu.shape[2]
    yu = jnp.pad(yu, ((0, 0), (dy // 2, dy - dy // 2), (dx // 2, dx - dx // 2), (0, 0)))
    cat = jnp.concatenate([xr, yu], axis=-1)                        # (n, Hr, Wr, ccat)

    # ---- fused DoubleConv(down=False) + 1x1 residual (Pallas) ----
    catp = jnp.pad(cat, ((0, 0), (2, 2), (1, 1), (0, ccatp - ccat))).astype(compute_dtype)
    w1 = jnp.pad(p['w1'], ((0, 0), (0, 0), (0, ccatp - ccat), (0, cmidp - cmid)))
    w1 = w1.reshape(9 * ccatp, cmidp).astype(compute_dtype)
    w2 = jnp.pad(p['w2'], ((0, 0), (0, 0), (0, cmidp - cmid), (0, coutp - cout)))
    w2 = w2.reshape(9 * cmidp, coutp).astype(compute_dtype)
    wr = jnp.pad(p['w_res'], ((0, ccatp - ccat), (0, coutp - cout))).astype(compute_dtype)

    s1, b1 = bn_fold(*p['bn1'])
    s1 = jnp.pad(s1, (0, cmidp - cmid), constant_values=1.0).reshape(1, cmidp).astype(f32)
    b1 = jnp.pad(b1, (0, cmidp - cmid)).reshape(1, cmidp).astype(f32)
    s2, b2 = bn_fold(*p['bn2'])
    s2 = jnp.pad(s2, (0, coutp - cout), constant_values=1.0).reshape(1, coutp).astype(f32)
    b2 = jnp.pad(b2, (0, coutp - cout)).reshape(1, coutp).astype(f32)

    out = double_conv_fused(catp, w1, s1, b1, w2, s2, b2, wr,
                            tile_rows=tile_rows, vmem_limit_bytes=vmem_limit_bytes)
    return jnp.transpose(out[..., :cout], (0, 3, 1, 2))


# -----------------------------------------------------------------------------
# Pure-JAX reference (lax.conv) for the correctness check.
# Operands are rounded to `compute_dtype` at the same points as the kernel so the
# comparison isolates kernel math from bf16 input rounding.
# -----------------------------------------------------------------------------
def _ref_conv(x_nhwc, w_hwio):
    return lax.conv_general_dilated(
        x_nhwc, w_hwio, window_strides=(1, 1), padding=((1, 1), (1, 1)),
        dimension_numbers=('NHWC', 'HWIO', 'NHWC'),
        precision=lax.Precision.HIGHEST)


def ref_forward(x_nchw, xres_nchw, p, *, compute_dtype=jnp.float32):
    q = lambda a: a.astype(compute_dtype).astype(jnp.float32)
    x = jnp.transpose(x_nchw, (0, 2, 3, 1))
    xr = jnp.transpose(xres_nchw, (0, 2, 3, 1))
    xu = bilinear_up2(x)
    yu = _ref_conv(q(xu), q(p['w_up']))
    dy = xr.shape[1] - yu.shape[1]
    dx = xr.shape[2] - yu.shape[2]
    yu = jnp.pad(yu, ((0, 0), (dy // 2, dy - dy // 2), (dx // 2, dx - dx // 2), (0, 0)))
    cat = q(jnp.concatenate([xr, yu], axis=-1))
    s1, b1 = bn_fold(*p['bn1'])
    h1 = jnp.maximum(_ref_conv(cat, q(p['w1'])) * s1 + b1, 0.0)
    s2, b2 = bn_fold(*p['bn2'])
    h2 = jnp.maximum(_ref_conv(q(h1), q(p['w2'])) * s2 + b2, 0.0)
    res = jnp.einsum('nhwc,co->nhwo', cat, q(p['w_res']),
                     precision=lax.Precision.HIGHEST)
    return jnp.transpose(h2 + res, (0, 3, 1, 2))


# -----------------------------------------------------------------------------
if __name__ == "__main__":
    key = jax.random.PRNGKey(0)
    k_x, k_xr, k_p = jax.random.split(key, 3)

    in_channels, out_channels = 8, 4      # pos_dim = 8 - 2*4 = 0
    N, H, W = 2, 8, 8                     # x_res is at 2x spatial resolution

    x = jax.random.normal(k_x, (N, in_channels, H, W), jnp.float32)           # NCHW
    x_res = jax.random.normal(k_xr, (N, out_channels, 2 * H, 2 * W), jnp.float32)
    params = init_params(k_p, in_channels, out_channels)

    # Strict f32 check (same operand precision as the reference).
    out32 = jax.block_until_ready(
        up_forward(x, x_res, params, compute_dtype=jnp.float32))
    assert out32.shape == (N, out_channels, 2 * H, 2 * W), out32.shape
    ref32 = jax.block_until_ready(
        ref_forward(x, x_res, params, compute_dtype=jnp.float32))
    err32 = float(jnp.max(jnp.abs(out32 - ref32)))
    if err32 > 2e-3:
        raise AssertionError(f"f32 Pallas kernel mismatch vs reference: {err32}")

    # Default bf16-MXU-operand / f32-accumulate path.
    outbf = jax.block_until_ready(up_forward(x, x_res, params))
    refbf = jax.block_until_ready(
        ref_forward(x, x_res, params, compute_dtype=jnp.bfloat16))
    errbf = float(jnp.max(jnp.abs(outbf - refbf)))
    if errbf > 5e-2:
        raise AssertionError(f"bf16 Pallas kernel mismatch vs reference: {errbf}")

    print("KERNEL_OK")
</pallas_src>

<mosaic_0001>
module attributes {stable_mosaic.version = 11 : i64} {
  func.func @kernel(%arg0: i32, %arg1: i32, %arg2: memref<2x18x18x128xf32, #tpu.memory_space<any>>, %arg3: memref<1152x128xf32, #tpu.memory_space<vmem>>, %arg4: memref<1x128xf32, #tpu.memory_space<vmem>>, %arg5: memref<1x128xf32, #tpu.memory_space<vmem>>, %arg6: memref<1x8x16x128xf32, #tpu.memory_space<vmem>>, %arg7: memref<2x10x18x128xf32, #tpu.memory_space<vmem>>, %arg8: memref<2x!tpu.dma_semaphore, #tpu.memory_space<semaphore_mem>>) attributes {dimension_semantics = [#tpu.dimension_semantics<parallel>, #tpu.dimension_semantics<arbitrary>], iteration_bounds = array<i64: 2, 2>, scalar_prefetch = 0 : i64, scratch_operands = 2 : i64, tpu.core_type = #tpu.core_type<tc>, window_params = [{}, {pipeline_mode = #tpu.pipeline_mode<synchronous>, transform_indices = @transform_1, window_bounds = array<i64: 1152, 128>}, {pipeline_mode = #tpu.pipeline_mode<synchronous>, transform_indices = @transform_2, window_bounds = array<i64: 1, 128>}, {pipeline_mode = #tpu.pipeline_mode<synchronous>, transform_indices = @transform_3, window_bounds = array<i64: 1, 128>}, {transform_indices = @transform_4, window_bounds = array<i64: 1, 8, 16, 128>}]} {
    %c2_i32 = arith.constant 2 : i32
    %c0_i32 = arith.constant 0 : i32
    %0 = arith.cmpi eq, %c2_i32, %c0_i32 : i32
    %c1_i32 = arith.constant 1 : i32
    %1 = arith.select %0, %c1_i32, %c2_i32 : i32
    %2 = arith.remsi %arg1, %1 : i32
    %c0_i32_0 = arith.constant 0 : i32
    %3 = arith.cmpi ne, %2, %c0_i32_0 : i32
    %c0_i32_1 = arith.constant 0 : i32
    %4 = arith.cmpi slt, %2, %c0_i32_1 : i32
    %c0_i32_2 = arith.constant 0 : i32
    %5 = arith.cmpi slt, %1, %c0_i32_2 : i32
    %6 = arith.xori %4, %5 : i1
    %7 = arith.andi %6, %3 : i1
    %8 = arith.addi %2, %1 : i32
    %9 = arith.select %7, %8, %2 : i32
    %c0_i32_3 = arith.constant 0 : i32
    %10 = arith.cmpi eq, %arg1, %c0_i32_3 : i32
    %11 = arith.extui %10 : i1 to i32
    %c0_i32_4 = arith.constant 0 : i32
    %12 = arith.cmpi ne, %11, %c0_i32_4 : i32
    scf.if %12 {
      %c8_i32_25 = arith.constant 8 : i32
      %58 = arith.muli %arg1, %c8_i32_25 : i32
      %c0_i32_26 = arith.constant 0 : i32
      %c0_i32_27 = arith.constant 0 : i32
      %59 = tpu.memref_slice %arg2[%arg0, %58, %c0_i32_26, %c0_i32_27] : memref<2x18x18x128xf32, #tpu.memory_space<any>> -> memref<1x10x18x128xf32, #tpu.memory_space<any>>
      %60 = tpu.memref_squeeze %59 : memref<1x10x18x128xf32, #tpu.memory_space<any>> -> memref<10x18x128xf32, #tpu.memory_space<any>>
      %c0_i32_28 = arith.constant 0 : i32
      %c0_i32_29 = arith.constant 0 : i32
      %c0_i32_30 = arith.constant 0 : i32
      %61 = tpu.memref_slice %arg7[%9, %c0_i32_28, %c0_i32_29, %c0_i32_30] : memref<2x10x18x128xf32, #tpu.memory_space<vmem>> -> memref<1x10x18x128xf32, #tpu.memory_space<vmem>>
      %62 = tpu.memref_squeeze %61 : memref<1x10x18x128xf32, #tpu.memory_space<vmem>> -> memref<10x18x128xf32, #tpu.memory_space<vmem>>
      %63 = tpu.memref_slice %arg8[%9] : memref<2x!tpu.dma_semaphore, #tpu.memory_space<semaphore_mem>> -> memref<1x!tpu.dma_semaphore, #tpu.memory_space<semaphore_mem>>
      %64 = tpu.memref_squeeze %63 : memref<1x!tpu.dma_semaphore, #tpu.memory_space<semaphore_mem>> -> memref<!tpu.dma_semaphore, #tpu.memory_space<semaphore_mem>>
      tpu.enqueue_dma source(%60 : memref<10x18x128xf32, #tpu.memory_space<any>>) target(%62 : memref<10x18x128xf32, #tpu.memory_space<vmem>>) target_semaphore(%64 : memref<!tpu.dma_semaphore, #tpu.memory_space<semaphore_mem>>)
    } else {
    }
    %c1_i32_5 = arith.constant 1 : i32
    %13 = arith.addi %arg1, %c1_i32_5 : i32
    %c2_i32_6 = arith.constant 2 : i32
    %14 = arith.cmpi slt, %13, %c2_i32_6 : i32
    %15 = arith.extui %14 : i1 to i32
    %c0_i32_7 = arith.constant 0 : i32
    %16 = arith.cmpi ne, %15, %c0_i32_7 : i32
    scf.if %16 {
      %c1_i32_25 = arith.constant 1 : i32
      %58 = arith.addi %arg1, %c1_i32_25 : i32
      %c1_i32_26 = arith.constant 1 : i32
      %59 = arith.subi %c1_i32_26, %9 : i32
      %c8_i32_27 = arith.constant 8 : i32
      %60 = arith.muli %58, %c8_i32_27 : i32
      %c0_i32_28 = arith.constant 0 : i32
      %c0_i32_29 = arith.constant 0 : i32
      %61 = tpu.memref_slice %arg2[%arg0, %60, %c0_i32_28, %c0_i32_29] : memref<2x18x18x128xf32, #tpu.memory_space<any>> -> memref<1x10x18x128xf32, #tpu.memory_space<any>>
      %62 = tpu.memref_squeeze %61 : memref<1x10x18x128xf32, #tpu.memory_space<any>> -> memref<10x18x128xf32, #tpu.memory_space<any>>
      %c0_i32_30 = arith.constant 0 : i32
      %c0_i32_31 = arith.constant 0 : i32
      %c0_i32_32 = arith.constant 0 : i32
      %63 = tpu.memref_slice %arg7[%59, %c0_i32_30, %c0_i32_31, %c0_i32_32] : memref<2x10x18x128xf32, #tpu.memory_space<vmem>> -> memref<1x10x18x128xf32, #tpu.memory_space<vmem>>
      %64 = tpu.memref_squeeze %63 : memref<1x10x18x128xf32, #tpu.memory_space<vmem>> -> memref<10x18x128xf32, #tpu.memory_space<vmem>>
      %65 = tpu.memref_slice %arg8[%59] : memref<2x!tpu.dma_semaphore, #tpu.memory_space<semaphore_mem>> -> memref<1x!tpu.dma_semaphore, #tpu.memory_space<semaphore_mem>>
      %66 = tpu.memref_squeeze %65 : memref<1x!tpu.dma_semaphore, #tpu.memory_space<semaphore_mem>> -> memref<!tpu.dma_semaphore, #tpu.memory_space<semaphore_mem>>
      tpu.enqueue_dma source(%62 : memref<10x18x128xf32, #tpu.memory_space<any>>) target(%64 : memref<10x18x128xf32, #tpu.memory_space<vmem>>) target_semaphore(%66 : memref<!tpu.dma_semaphore, #tpu.memory_space<semaphore_mem>>)
    } else {
    }
    %c8_i32 = arith.constant 8 : i32
    %17 = arith.muli %arg1, %c8_i32 : i32
    %c0_i32_8 = arith.constant 0 : i32
    %c0_i32_9 = arith.constant 0 : i32
    %18 = tpu.memref_slice %arg2[%arg0, %17, %c0_i32_8, %c0_i32_9] : memref<2x18x18x128xf32, #tpu.memory_space<any>> -> memref<1x10x18x128xf32, #tpu.memory_space<any>>
    %19 = tpu.memref_squeeze %18 : memref<1x10x18x128xf32, #tpu.memory_space<any>> -> memref<10x18x128xf32, #tpu.memory_space<any>>
    %c0_i32_10 = arith.constant 0 : i32
    %c0_i32_11 = arith.constant 0 : i32
    %c0_i32_12 = arith.constant 0 : i32
    %20 = tpu.memref_slice %arg7[%9, %c0_i32_10, %c0_i32_11, %c0_i32_12] : memref<2x10x18x128xf32, #tpu.memory_space<vmem>> -> memref<1x10x18x128xf32, #tpu.memory_space<vmem>>
    %21 = tpu.memref_squeeze %20 : memref<1x10x18x128xf32, #tpu.memory_space<vmem>> -> memref<10x18x128xf32, #tpu.memory_space<vmem>>
    %22 = tpu.memref_slice %arg8[%9] : memref<2x!tpu.dma_semaphore, #tpu.memory_space<semaphore_mem>> -> memref<1x!tpu.dma_semaphore, #tpu.memory_space<semaphore_mem>>
    %23 = tpu.memref_squeeze %22 : memref<1x!tpu.dma_semaphore, #tpu.memory_space<semaphore_mem>> -> memref<!tpu.dma_semaphore, #tpu.memory_space<semaphore_mem>>
    tpu.wait_dma2 semaphore(%23 : memref<!tpu.dma_semaphore, #tpu.memory_space<semaphore_mem>>) src(%19 : memref<10x18x128xf32, #tpu.memory_space<any>>) dst(%21 : memref<10x18x128xf32, #tpu.memory_space<vmem>>)
    %24 = arith.index_cast %9 : i32 to index
    %c0 = arith.constant 0 : index
    %c0_13 = arith.constant 0 : index
    %c0_14 = arith.constant 0 : index
    %25 = vector.load %arg7[%24, %c0, %c0_13, %c0_14] : memref<2x10x18x128xf32, #tpu.memory_space<vmem>>, vector<1x10x18x128xf32>
    %26 = vector.shape_cast %25 : vector<1x10x18x128xf32> to vector<10x18x128xf32>
    %27 = vector.extract_strided_slice %26 {offsets = [0, 0, 0], sizes = [8, 16, 128], strides = [1, 1, 1]} : vector<10x18x128xf32> to vector<8x16x128xf32>
    %28 = vector.shape_cast %27 : vector<8x16x128xf32> to vector<128x128xf32>
    %29 = vector.extract_strided_slice %26 {offsets = [0, 1, 0], sizes = [8, 16, 128], strides = [1, 1, 1]} : vector<10x18x128xf32> to vector<8x16x128xf32>
    %30 = vector.shape_cast %29 : vector<8x16x128xf32> to vector<128x128xf32>
    %31 = vector.extract_strided_slice %26 {offsets = [0, 2, 0], sizes = [8, 16, 128], strides = [1, 1, 1]} : vector<10x18x128xf32> to vector<8x16x128xf32>
    %32 = vector.shape_cast %31 : vector<8x16x128xf32> to vector<128x128xf32>
    %33 = vector.extract_strided_slice %26 {offsets = [1, 0, 0], sizes = [8, 16, 128], strides = [1, 1, 1]} : vector<10x18x128xf32> to vector<8x16x128xf32>
    %34 = vector.shape_cast %33 : vector<8x16x128xf32> to vector<128x128xf32>
    %35 = vector.extract_strided_slice %26 {offsets = [1, 1, 0], sizes = [8, 16, 128], strides = [1, 1, 1]} : vector<10x18x128xf32> to vector<8x16x128xf32>
    %36 = vector.shape_cast %35 : vector<8x16x128xf32> to vector<128x128xf32>
    %37 = vector.extract_strided_slice %26 {offsets = [1, 2, 0], sizes = [8, 16, 128], strides = [1, 1, 1]} : vector<10x18x128xf32> to vector<8x16x128xf32>
    %38 = vector.shape_cast %37 : vector<8x16x128xf32> to vector<128x128xf32>
    %39 = vector.extract_strided_slice %26 {offsets = [2, 0, 0], sizes = [8, 16, 128], strides = [1, 1, 1]} : vector<10x18x128xf32> to vector<8x16x128xf32>
    %40 = vector.shape_cast %39 : vector<8x16x128xf32> to vector<128x128xf32>
    %41 = vector.extract_strided_slice %26 {offsets = [2, 1, 0], sizes = [8, 16, 128], strides = [1, 1, 1]} : vector<10x18x128xf32> to vector<8x16x128xf32>
    %42 = vector.shape_cast %41 : vector<8x16x128xf32> to vector<128x128xf32>
    %43 = vector.extract_strided_slice %26 {offsets = [2, 2, 0], sizes = [8, 16, 128], strides = [1, 1, 1]} : vector<10x18x128xf32> to vector<8x16x128xf32>
    %44 = vector.shape_cast %43 : vector<8x16x128xf32> to vector<128x128xf32>
    %45 = tpu.concatenate %28, %30, %32, %34, %36, %38, %40, %42, %44 in 1 : vector<128x128xf32>, vector<128x128xf32>, vector<128x128xf32>, vector<128x128xf32>, vector<128x128xf32>, vector<128x128xf32>, vector<128x128xf32>, vector<128x128xf32>, vector<128x128xf32> -> vector<128x1152xf32>
    %c0_15 = arith.constant 0 : index
    %c0_16 = arith.constant 0 : index
    %46 = vector.load %arg3[%c0_15, %c0_16] : memref<1152x128xf32, #tpu.memory_space<vmem>>, vector<1152x128xf32>
    %cst = arith.constant dense<0.000000e+00> : vector<128x128xf32>
    %47 = tpu.matmul %45, %46, %cst {dimension_numbers = #tpu.dot_dimension_numbers<[1], [0], [0], [1], [0, 0, 1, 1], [], []>} : vector<128x1152xf32>, vector<1152x128xf32>, vector<128x128xf32> -> vector<128x128xf32>
    %c0_17 = arith.constant 0 : index
    %c0_18 = arith.constant 0 : index
    %48 = vector.load %arg4[%c0_17, %c0_18] : memref<1x128xf32, #tpu.memory_space<vmem>>, vector<1x128xf32>
    %49 = vector.broadcast %48 : vector<1x128xf32> to vector<128x128xf32>
    %50 = arith.mulf %47, %49 : vector<128x128xf32>
    %c0_19 = arith.constant 0 : index
    %c0_20 = arith.constant 0 : index
    %51 = vector.load %arg5[%c0_19, %c0_20] : memref<1x128xf32, #tpu.memory_space<vmem>>, vector<1x128xf32>
    %52 = vector.broadcast %51 : vector<1x128xf32> to vector<128x128xf32>
    %53 = arith.addf %50, %52 : vector<128x128xf32>
    %54 = vector.shape_cast %53 : vector<128x128xf32> to vector<8x16x128xf32>
    %c0_21 = arith.constant 0 : index
    %c0_22 = arith.constant 0 : index
    %c0_23 = arith.constant 0 : index
    %c0_24 = arith.constant 0 : index
    %55 = vector.load %arg6[%c0_21, %c0_22, %c0_23, %c0_24] : memref<1x8x16x128xf32, #tpu.memory_space<vmem>>, vector<1x8x16x128xf32>
    %56 = vector.shape_cast %55 : vector<1x8x16x128xf32> to vector<8x16x128xf32>
    %57 = vector.shape_cast %54 : vector<8x16x128xf32> to vector<1x8x16x128xf32>
    tpu.vector_store %arg6[%c0_21, %c0_22, %c0_23, %c0_24], %57 {strides = array<i32>} : memref<1x8x16x128xf32, #tpu.memory_space<vmem>>, vector<1x8x16x128xf32>,
    return
  }
  func.func @transform_1(%arg0: i32, %arg1: i32) -> (i32, i32) {
    %c0_i32 = arith.constant 0 : i32
    %c0_i32_0 = arith.constant 0 : i32
    %c0_i32_1 = arith.constant 0 : i32
    return %c0_i32, %c0_i32_0 : i32, i32
  }
  func.func @transform_2(%arg0: i32, %arg1: i32) -> (i32, i32) {
    %c0_i32 = arith.constant 0 : i32
    %c0_i32_0 = arith.constant 0 : i32
    %c0_i32_1 = arith.constant 0 : i32
    return %c0_i32, %c0_i32_0 : i32, i32
  }
  func.func @transform_3(%arg0: i32, %arg1: i32) -> (i32, i32) {
    %c0_i32 = arith.constant 0 : i32
    %c0_i32_0 = arith.constant 0 : i32
    %c0_i32_1 = arith.constant 0 : i32
    return %c0_i32, %c0_i32_0 : i32, i32
  }
  func.func @transform_4(%arg0: i32, %arg1: i32) -> (i32, i32, i32, i32) {
    %c0_i32 = arith.constant 0 : i32
    %c0_i32_0 = arith.constant 0 : i32
    %c0_i32_1 = arith.constant 0 : i32
    return %arg0, %arg1, %c0_i32, %c0_i32_0 : i32, i32, i32, i32
  }
}

</mosaic_0001>

<bundles_post_ra>
// kernel: tpu_custom_call.1
= control target key start
LH: loop header
LB: loop body
LE: loop exit
PB: predicated region body
PF: predicated region fallthrough
CT: control target
= control target key end

     0   :  { %s3827_s0 = inlined_call_operand.vmem [shape: f32[2,18,18,128], index: 0, kind: input, shape index: {}]   ;;  %s3828_s1 = inlined_call_operand.vmem [shape: f32[1152,128], index: 1, kind: input, shape index: {}]   ;;  %s3829_s2 = inlined_call_operand.vmem [shape: f32[1,128], index: 2, kind: input, shape index: {}]   ;;  %s3830_s3 = inlined_call_operand.vmem [shape: f32[1,128], index: 3, kind: input, shape index: {}]   ;;  %s3831_s4 = inlined_call_operand.hbm [shape: f32[2,16,16,128], index: 4, kind: output, shape index: {}]  }
   0x1   :  { %3833 = sst [smem:[#allocation10_spill]] %s3827_s0 }
   0x2   :  { %9 = vsyncpa [#allocation5], 0 }
   0x3   :  { %11 = vsyncpa [#allocation5 + $0x1], 0  ;;  %s2618_s15 = smov 0   ;;  %s2620_s16 = smov 0  }
   0x4   :  { %s2622_s17 = smov 0   ;;  %s2624_s18 = smov 0  }
   0x5   :  { %s2626_s19 = smov 0   ;;  %s2628_s20 = smov 0  }
   0x6   :  { %s2630_s21 = smov 0   ;;  %s2632_s22 = smov 0  }
   0x7 LB: > { %s1740_s23 = sadd.s32 4294967295, %s2588_s22   ;;  %s1741_s24 = sadd.s32 4294967294, %s2588_s22   ;;  %s2588_s22 = sphi %s2632_s22, %s17_s22   ;;  %s2584_s21 = sphi %s2630_s21, %s3845_s21   ;;  %s2580_s20 = sphi %s2628_s20, %s3844_s20   ;;  %s2576_s19 = sphi %s2626_s19, %s3843_s19   ;;  %s2572_s18 = sphi %s2624_s18, %s3842_s18   ;;  %s2568_s17 = sphi %s2622_s17, %s3841_s17   ;;  %s2564_s16 = sphi %s2620_s16, %s3840_s16   ;;  %s2560_s15 = sphi %s2618_s15, %s3839_s15  }
   0x8   : > { %s26_s25 = sadd.s32 1, %s2580_s20  ;;  %s29_s26 = sadd.s32 1, %s2584_s21 }
   0x9   : > { %p27_p0 = scmp.ge.s32.totalorder %s26_s25, 2  ;;  %p111_p1 = scmp.ne.s32.totalorder %s2568_s17, %s2564_s16 }
   0xa   : > { %p112_p2 = scmp.eq.s32.totalorder %s1740_s23, 3  ;;  %p117_p5 = scmp.ne.s32.totalorder %s2564_s16, %s2560_s15 }
   0xb   : > { %s3847_s25 = smov (%p27_p0, %s26_s25), 0  ;;  %s3849_s26 = smov (!%p27_p0, %s29_s26), %s2584_s21 }
   0xc   : > { %s97_s27 = ssub.s32 %s2580_s20, %s3847_s25  ;;  %p2669_p3 = por %p112_p2, %p111_p1 }
   0xd   : > { %p31_p4 = scmp.ge.s32.totalorder %s3849_s26, 2  ;;  %p118_p6 = scmp.eq.s32.totalorder %s1741_s24, 3 }
   0xe   : > { %p1743_p7 = scmp.ge.s32.totalorder %s2588_s22, 1  ;;  %p145_p9 = scmp.lt.s32.totalorder %s2588_s22, 5 }
   0xf   : > { %s3851_s26 = smov (%p31_p4, %s3849_s26), 0  ;;  %p2678_p8 = por %p118_p6, %p117_p5 }
  0x10   : > { %s96_s30 = ssub.s32 %s2584_s21, %s3851_s26  ;;  %s101_s5 = sadd.s32 1, %s2568_s17 }
  0x11   : > { %s98_s6 = sor.u32 %s97_s27, %s96_s30  ;;  %p146_p10 = pnand %p1743_p7, %p145_p9 }
  0x12   : > { %p99_p11 = scmp.eq.s32.totalorder %s98_s6, 0  ;;  %s3832_s8 = sand.u32 (!%p146_p10), 1, %s2564_s16  }
  0x13   : > { %149 = sbr.rel (%p146_p10) target bundleno = 496 (0x1f0), region = 32  ;;  %p165_p12 = scmp.lt.s32.totalorder (!%p146_p10), %s2572_s18, 0 }
  0x14   : > { %s2687_s7 = scalar_select %p99_p11, %s2568_s17, %s101_s5  }
  0x15   : > { %s1744_s9 = sshll.u32 (!%p146_p10), %s3832_s8, 7  ;;  %s166_s10 = ssub.s32 (!%p146_p10), 0, %s2572_s18 }
  0x16   : > { %s1745_s11 = smin.u32 (!%p146_p10), %s2572_s18, %s166_s10  ;;  %s2697_s23 = scalar_lea.vmem (!%p146_p10), [#allocation4], %s1744_s9 }
  0x17   : > { %s168_s12 = sand.u32 (!%p146_p10), 1, %s1745_s11   ;;  %p1748_p0 = scmp.ne.s32.totalorder (!%p146_p10), %s2572_s18, 0 }
  0x18   : > { %s169_s13 = ssub.s32 (!%p146_p10), 0, %s168_s12 }
  0x1a   : > { %s3853_s13 = smov (!%p165_p12, %s169_s13), %s168_s12  ;;  %180 = sbr.rel (%p1748_p0) target bundleno = 53 (0x35), region = 36 }
  0x1b   : > { %p1747_p13 = scmp.lt.s32.totalorder %s3853_s13, 0  ;;  %s175_s14 = sadd.s32 2, %s3853_s13 }
  0x1c   : > { %s1750_s24 = smul.u32 (!%p1748_p0), 192, %s2572_s18  ;;  %s3836_s0 = sld [smem:[#allocation10_spill]] (!%p1748_p0) }
  0x1d   : > { %s3855_s14 = smov (!%p1747_p13, %s175_s14), %s3853_s13  ;;  %s183_s27 = smul.u32 (!%p1748_p0), 432, %s2576_s19 }
  0x1e   : > { %s186_s30 = smul.u32 (!%p1748_p0), 240, %s3855_s14  ;;  %s188_s12 = scalar_lea.sflag (!%p1748_p0), [#allocation3], %s3855_s14 }
  0x1f   : > { %s184_s5 = sadd.s32 (!%p1748_p0), %s1750_s24, %s183_s27 }
  0x20   : > { %s2711_s9 = scalar_lea.vmem (!%p1748_p0), [#allocation2], %s186_s30 }
  0x22   : > { %s2706_s11 = scalar_lea.vmem %s3836_s0, %s184_s5 }
  0x23   : > { %v244_v0 = vld [vmem:[%s2706_s11] sm:$0xff]  ;;  %v246_v1 = vld [vmem:[%s2706_s11 + $0x8] sm:$0xff]  ;;  %v248_v2 = vld [vmem:[%s2706_s11 + $0x18] sm:$0xff] }
  0x24   : > { %245 = vst [vmem:[%s2711_s9] sm:$0xff] %v244_v0  ;;  %247 = vst [vmem:[%s2711_s9 + $0x8] sm:$0xff] %v246_v1  ;;  %v250_v3 = vld [vmem:[%s2706_s11 + $0x20] sm:$0xff]  ;;  %v252_v4 = vld [vmem:[%s2706_s11 + $0x30] sm:$0xff] }
  0x25   : > { %249 = vst [vmem:[%s2711_s9 + $0x18] sm:$0xff] %v248_v2  ;;  %v254_v5 = vld [vmem:[%s2706_s11 + $0x38] sm:$0xff]  ;;  %251 = vst [vmem:[%s2711_s9 + $0x20] sm:$0xff] %v250_v3  ;;  %v256_v6 = vld [vmem:[%s2706_s11 + $0x48] sm:$0xff] }
  0x26   : > { %253 = vst [vmem:[%s2711_s9 + $0x30] sm:$0xff] %v252_v4  ;;  %255 = vst [vmem:[%s2711_s9 + $0x38] sm:$0xff] %v254_v5  ;;  %v258_v7 = vld [vmem:[%s2706_s11 + $0x50] sm:$0xff]  ;;  %v260_v8 = vld [vmem:[%s2706_s11 + $0x60] sm:$0xff] }
  0x27   : > { %257 = vst [vmem:[%s2711_s9 + $0x48] sm:$0xff] %v256_v6  ;;  %259 = vst [vmem:[%s2711_s9 + $0x50] sm:$0xff] %v258_v7  ;;  %v262_v9 = vld [vmem:[%s2706_s11 + $0x68] sm:$0xff]  ;;  %v264_v10 = vld [vmem:[%s2706_s11 + $0x78] sm:$0xff] }
  0x28   : > { %261 = vst [vmem:[%s2711_s9 + $0x60] sm:$0xff] %v260_v8  ;;  %v266_v11 = vld [vmem:[%s2706_s11 + $0x80] sm:$0xff]  ;;  %263 = vst [vmem:[%s2711_s9 + $0x68] sm:$0xff] %v262_v9  ;;  %v268_v12 = vld [vmem:[%s2706_s11 + $0x90] sm:$0xff] }
  0x29   : > { %265 = vst [vmem:[%s2711_s9 + $0x78] sm:$0xff] %v264_v10  ;;  %267 = vst [vmem:[%s2711_s9 + $0x80] sm:$0xff] %v266_v11  ;;  %v270_v13 = vld [vmem:[%s2706_s11 + $0x98] sm:$0xff]  ;;  %v272_v14 = vld [vmem:[%s2706_s11 + $0xa8] sm:$0xff] }
  0x2a   : > { %269 = vst [vmem:[%s2711_s9 + $0x90] sm:$0xff] %v268_v12  ;;  %271 = vst [vmem:[%s2711_s9 + $0x98] sm:$0xff] %v270_v13  ;;  %v274_v15 = vld [vmem:[%s2706_s11 + $0xb0] sm:$0xff]  ;;  %v276_v16 = vld [vmem:[%s2706_s11 + $0xc0] sm:$0xff] }
  0x2b   : > { %273 = vst [vmem:[%s2711_s9 + $0xa8] sm:$0xff] %v272_v14  ;;  %v278_v17 = vld [vmem:[%s2706_s11 + $0xc8] sm:$0xff]  ;;  %275 = vst [vmem:[%s2711_s9 + $0xb0] sm:$0xff] %v274_v15  ;;  %v280_v18 = vld [vmem:[%s2706_s11 + $0xd8] sm:$0xff] }
  0x2c   : > { %277 = vst [vmem:[%s2711_s9 + $0xc0] sm:$0xff] %v276_v16  ;;  %279 = vst [vmem:[%s2711_s9 + $0xc8] sm:$0xff] %v278_v17  ;;  %v282_v19 = vld [vmem:[%s2706_s11 + $0xe0] sm:$0xff]  ;;  %v1751_v20 = vld [vmem:[%s2706_s11 + $0x10] sm:$0x3] }
  0x2d   : > { %281 = vst [vmem:[%s2711_s9 + $0xd8] sm:$0xff] %v280_v18  ;;  %283 = vst [vmem:[%s2711_s9 + $0xe0] sm:$0xff] %v282_v19  ;;  %v1753_v21 = vld [vmem:[%s2706_s11 + $0x28] sm:$0x3]  ;;  %v1755_v22 = vld [vmem:[%s2706_s11 + $0x40] sm:$0x3] }
  0x2e   : > { %1752 = vst [vmem:[%s2711_s9 + $0x10] sm:$0x3] %v1751_v20  ;;  %v1757_v23 = vld [vmem:[%s2706_s11 + $0x58] sm:$0x3]  ;;  %1754 = vst [vmem:[%s2711_s9 + $0x28] sm:$0x3] %v1753_v21 }
  0x2f   : > { %1756 = vst [vmem:[%s2711_s9 + $0x40] sm:$0x3] %v1755_v22  ;;  %1758 = vst [vmem:[%s2711_s9 + $0x58] sm:$0x3] %v1757_v23  ;;  %v1759_v24 = vld [vmem:[%s2706_s11 + $0x70] sm:$0x3] }
  0x30   : > { %v1761_v25 = vld [vmem:[%s2706_s11 + $0x88] sm:$0x3]  ;;  %v1763_v26 = vld [vmem:[%s2706_s11 + $0xa0] sm:$0x3]  ;;  %1760 = vst [vmem:[%s2711_s9 + $0x70] sm:$0x3] %v1759_v24 }
  0x31   : > { %1762 = vst [vmem:[%s2711_s9 + $0x88] sm:$0x3] %v1761_v25  ;;  %1764 = vst [vmem:[%s2711_s9 + $0xa0] sm:$0x3] %v1763_v26  ;;  %v1765_v27 = vld [vmem:[%s2706_s11 + $0xb8] sm:$0x3] }
  0x32   : > { %v1767_v28 = vld [vmem:[%s2706_s11 + $0xd0] sm:$0x3]  ;;  %v1769_v29 = vld [vmem:[%s2706_s11 + $0xe8] sm:$0x3]  ;;  %1766 = vst [vmem:[%s2711_s9 + $0xb8] sm:$0x3] %v1765_v27 }
  0x33   : > { %1768 = vst [vmem:[%s2711_s9 + $0xd0] sm:$0x3] %v1767_v28  ;;  %1770 = vst [vmem:[%s2711_s9 + $0xe8] sm:$0x3] %v1769_v29 }
  0x34   : > { %316 = vsyncadd %s188_s12, 2880 }
  0x35 PF: > { %s317_s13 = sadd.s32 1, %s2572_s18 }
  0x36   : > { %p1771_p1 = scmp.ge.s32.totalorder %s317_s13, 2 }
  0x37   : > { %s322_s24 = ssub.s32 (!%p1771_p1), 1, %s3855_s14  ;;  %s1665_s27 = smul.u32 (!%p1771_p1), 192, %s2572_s18 }
  0x38   : > { %321 = sbr.rel (%p1771_p1) target bundleno = 81 (0x51), region = 77  ;;  %s3837_s0 = sld [smem:[#allocation10_spill]] (!%p1771_p1) }
  0x39   : > { %s1666_s30 = smul.u32 (!%p1771_p1), 432, %s2576_s19  ;;  %s330_s13 = scalar_lea.sflag (!%p1771_p1), [#allocation3], %s322_s24 }
  0x3a   : > { %s328_s5 = smul.u32 (!%p1771_p1), 240, %s322_s24 }
  0x3b   : > { %s1667_s6 = sadd.s32 (!%p1771_p1), %s1666_s30, %s1665_s27 }
  0x3c   : > { %s2785_s12 = scalar_lea.vmem (!%p1771_p1), [#allocation2], %s328_s5 }
  0x3e   : > { %s2780_s9 = scalar_lea.vmem (!%p1771_p1), %s3837_s0, %s1667_s6 }
  0x3f   : > { %v1773_v30 = vld [vmem:[%s2780_s9 + $0xc0] sm:$0xff]  ;;  %v1774_v31 = vld [vmem:[%s2780_s9 + $0xc8] sm:$0xff]  ;;  %v1775_v32 = vld [vmem:[%s2780_s9 + $0xd8] sm:$0xff] }
  0x40   : > { %387 = vst [vmem:[%s2785_s12] sm:$0xff] %v1773_v30  ;;  %389 = vst [vmem:[%s2785_s12 + $0x8] sm:$0xff] %v1774_v31  ;;  %v1776_v33 = vld [vmem:[%s2780_s9 + $0xe0] sm:$0xff]  ;;  %v1777_v34 = vld [vmem:[%s2780_s9 + $0xf0] sm:$0xff] }
  0x41   : > { %391 = vst [vmem:[%s2785_s12 + $0x18] sm:$0xff] %v1775_v32  ;;  %v1778_v35 = vld [vmem:[%s2780_s9 + $0xf8] sm:$0xff]  ;;  %393 = vst [vmem:[%s2785_s12 + $0x20] sm:$0xff] %v1776_v33  ;;  %v1779_v36 = vld [vmem:[%s2780_s9 + $0x108] sm:$0xff] }
  0x42   : > { %395 = vst [vmem:[%s2785_s12 + $0x30] sm:$0xff] %v1777_v34  ;;  %397 = vst [vmem:[%s2785_s12 + $0x38] sm:$0xff] %v1778_v35  ;;  %v1780_v37 = vld [vmem:[%s2780_s9 + $0x110] sm:$0xff]  ;;  %v1781_v38 = vld [vmem:[%s2780_s9 + $0x120] sm:$0xff] }
  0x43   : > { %399 = vst [vmem:[%s2785_s12 + $0x48] sm:$0xff] %v1779_v36  ;;  %401 = vst [vmem:[%s2785_s12 + $0x50] sm:$0xff] %v1780_v37  ;;  %v1782_v39 = vld [vmem:[%s2780_s9 + $0x128] sm:$0xff]  ;;  %v1783_v40 = vld [vmem:[%s2780_s9 + $0x138] sm:$0xff] }
  0x44   : > { %403 = vst [vmem:[%s2785_s12 + $0x60] sm:$0xff] %v1781_v38  ;;  %v1784_v41 = vld [vmem:[%s2780_s9 + $0x140] sm:$0xff]  ;;  %405 = vst [vmem:[%s2785_s12 + $0x68] sm:$0xff] %v1782_v39  ;;  %v1785_v42 = vld [vmem:[%s2780_s9 + $0x150] sm:$0xff] }
  0x45   : > { %407 = vst [vmem:[%s2785_s12 + $0x78] sm:$0xff] %v1783_v40  ;;  %409 = vst [vmem:[%s2785_s12 + $0x80] sm:$0xff] %v1784_v41  ;;  %v1786_v43 = vld [vmem:[%s2780_s9 + $0x158] sm:$0xff]  ;;  %v1787_v44 = vld [vmem:[%s2780_s9 + $0x168] sm:$0xff] }
  0x46   : > { %411 = vst [vmem:[%s2785_s12 + $0x90] sm:$0xff] %v1785_v42  ;;  %413 = vst [vmem:[%s2785_s12 + $0x98] sm:$0xff] %v1786_v43  ;;  %v1788_v45 = vld [vmem:[%s2780_s9 + $0x170] sm:$0xff]  ;;  %v1789_v46 = vld [vmem:[%s2780_s9 + $0x180] sm:$0xff] }
  0x47   : > { %415 = vst [vmem:[%s2785_s12 + $0xa8] sm:$0xff] %v1787_v44  ;;  %v1790_v47 = vld [vmem:[%s2780_s9 + $0x188] sm:$0xff]  ;;  %417 = vst [vmem:[%s2785_s12 + $0xb0] sm:$0xff] %v1788_v45  ;;  %v1791_v48 = vld [vmem:[%s2780_s9 + $0x198] sm:$0xff] }
  0x48   : > { %419 = vst [vmem:[%s2785_s12 + $0xc0] sm:$0xff] %v1789_v46  ;;  %421 = vst [vmem:[%s2785_s12 + $0xc8] sm:$0xff] %v1790_v47  ;;  %v1792_v49 = vld [vmem:[%s2780_s9 + $0x1a0] sm:$0xff]  ;;  %v1793_v50 = vld [vmem:[%s2780_s9 + $0xd0] sm:$0x3] }
  0x49   : > { %423 = vst [vmem:[%s2785_s12 + $0xd8] sm:$0xff] %v1791_v48  ;;  %425 = vst [vmem:[%s2785_s12 + $0xe0] sm:$0xff] %v1792_v49  ;;  %v1795_v51 = vld [vmem:[%s2780_s9 + $0xe8] sm:$0x3]  ;;  %v1797_v52 = vld [vmem:[%s2780_s9 + $0x100] sm:$0x3] }
  0x4a   : > { %1794 = vst [vmem:[%s2785_s12 + $0x10] sm:$0x3] %v1793_v50  ;;  %v1799_v53 = vld [vmem:[%s2780_s9 + $0x118] sm:$0x3]  ;;  %1796 = vst [vmem:[%s2785_s12 + $0x28] sm:$0x3] %v1795_v51 }
  0x4b   : > { %1798 = vst [vmem:[%s2785_s12 + $0x40] sm:$0x3] %v1797_v52  ;;  %1800 = vst [vmem:[%s2785_s12 + $0x58] sm:$0x3] %v1799_v53  ;;  %v1801_v54 = vld [vmem:[%s2780_s9 + $0x130] sm:$0x3] }
  0x4c   : > { %v1803_v55 = vld [vmem:[%s2780_s9 + $0x148] sm:$0x3]  ;;  %v1805_v56 = vld [vmem:[%s2780_s9 + $0x160] sm:$0x3]  ;;  %1802 = vst [vmem:[%s2785_s12 + $0x70] sm:$0x3] %v1801_v54 }
  0x4d   : > { %1804 = vst [vmem:[%s2785_s12 + $0x88] sm:$0x3] %v1803_v55  ;;  %1806 = vst [vmem:[%s2785_s12 + $0xa0] sm:$0x3] %v1805_v56  ;;  %v1807_v57 = vld [vmem:[%s2780_s9 + $0x178] sm:$0x3] }
  0x4e   : > { %v1809_v58 = vld [vmem:[%s2780_s9 + $0x190] sm:$0x3]  ;;  %v1811_v59 = vld [vmem:[%s2780_s9 + $0x1a8] sm:$0x3]  ;;  %1808 = vst [vmem:[%s2785_s12 + $0xb8] sm:$0x3] %v1807_v57 }
  0x4f   : > { %1810 = vst [vmem:[%s2785_s12 + $0xd0] sm:$0x3] %v1809_v58  ;;  %1812 = vst [vmem:[%s2785_s12 + $0xe8] sm:$0x3] %v1811_v59 }
  0x50   : > { %458 = vsyncadd %s330_s13, 2880 }
  0x51 PF: > { %s459_s27 = smul.u32 240, %s3855_s14  ;;  %s461_s5 = scalar_lea.sflag [#allocation3], %s3855_s14 }
  0x53   : > { %s2847_s30 = scalar_lea.vmem [#allocation2], %s459_s27 }
  0x54   : > { %2552 = dma.done.wait %s461_s5, 2880 }
  0x55   : > { %2553 = vsyncadd %s461_s5, 4294964416  ;;  %v684_v60 = vld [vmem:[%s3828_s1 + $0x80] sm:$0xff]  ;;  %v685_v61 = vld [vmem:[%s3828_s1 + $0x88] sm:$0xff]  ;;  %vm520_vm0 = vcmask 1046528   ;;  %vm577_vm1 = vcmask 1045504   ;;  %s1834_s14 = sshll.u32 %s2572_s18, 4 }
  0x56   : > { %v716_v62 = vld [vmem:[%s3828_s1 + $0x180] sm:$0xff]  ;;  %v2243_v63 = vpack.c.bf16 %v685_v61, %v684_v60  ;;  %v717_v0 = vld [vmem:[%s3828_s1 + $0x188] sm:$0xff]  ;;  %v686_v7 = vld [vmem:[%s3828_s1 + $0x90] sm:$0xff]  ;;  %s1828_s27 = sshll.u32 %s2576_s19, 5  ;;  %s1616_s5 = sshll.u32 %s2697_s23, 4  ;;  %s3766_s5 = int_to_ptr.vmem [resolvable:$true] %s1616_s5 }
  0x57   : > { %v668_v1 = vld [vmem:[%s3828_s1] sm:$0xff]  ;;  %v669_v2 = vld [vmem:[%s3828_s1 + $0x8] sm:$0xff]  ;;  %v2275_v3 = vpack.c.bf16 %v717_v0, %v716_v62  ;;  %v687_v9 = vld [vmem:[%s3828_s1 + $0x98] sm:$0xff]  ;;  %s1613_s18 = sadd.s32 %s1834_s14, %s1828_s27  ;;  %s3838_s11 = sand.u32 1, %s2564_s16  }
  0x58   : > { %v2245_v4 = vpack.c.bf16 %v669_v2, %v668_v1  ;;  %v700_v5 = vld [vmem:[%s3828_s1 + $0x100] sm:$0xff]  ;;  %v701_v6 = vld [vmem:[%s3828_s1 + $0x108] sm:$0xff]  ;;  %2244 = vmatprep.subr.bf16.mxu0 %v2243_v63  ;;  %v718_v10 = vld [vmem:[%s3828_s1 + $0x190] sm:$0xff]  ;;  %v2247_v12 = vpack.c.bf16 %v687_v9, %v686_v7  ;;  %s1829_s19 = sshll.u32 %s1613_s18, 7  ;;  %s3775_s9 = scalar_lea.sflag [#allocation5], %s3838_s11 }
  0x59   : > { %v2277_v8 = vpack.c.bf16 %v701_v6, %v700_v5  ;;  %v719_v11 = vld [vmem:[%s3828_s1 + $0x198] sm:$0xff]  ;;  %2276 = vmatprep.subr.bf16.mxu1 %v2275_v3  ;;  %v670_v14 = vld [vmem:[%s3828_s1 + $0x10] sm:$0xff]  ;;  %v688_v19 = vld [vmem:[%s3828_s1 + $0xa0] sm:$0xff]  ;;  %s3764_s10 = scalar_lea.hbm %s3831_s4, %s1829_s19  ;;  %s2492_s12 = scalar_lea.vmem %s3766_s5, 2048 }
  0x5a   : > { %2246 = vmatpush3.bf16.msra.mxu0 %v2245_v4  ;;  %v2279_v13 = vpack.c.bf16 %v719_v11, %v718_v10  ;;  %v671_v15 = vld [vmem:[%s3828_s1 + $0x18] sm:$0xff]  ;;  %v702_v16 = vld [vmem:[%s3828_s1 + $0x110] sm:$0xff]  ;;  %v689_v20 = vld [vmem:[%s3828_s1 + $0xa8] sm:$0xff]  ;;  %p2493_p2 = scmp.ne.s32.totalorder %s3766_s5, %s2492_s12 }
  0x5b   : > { %2278 = vmatpush3.bf16.msra.mxu1 %v2277_v8  ;;  %v2249_v17 = vpack.c.bf16 %v671_v15, %v670_v14  ;;  %v703_v18 = vld [vmem:[%s3828_s1 + $0x118] sm:$0xff]  ;;  %2248 = vmatprep.subr.bf16.mxu0 %v2247_v12  ;;  %v2251_v22 = vpack.c.bf16 %v689_v20, %v688_v19  ;;  %v720_v23 = vld [vmem:[%s3828_s1 + $0x1a0] sm:$0xff]  ;;  %v721_v24 = vld [vmem:[%s3828_s1 + $0x1a8] sm:$0xff] }
  0x5c   : > { %2280 = vmatprep.subr.bf16.mxu1 %v2279_v13  ;;  %v2281_v21 = vpack.c.bf16 %v703_v18, %v702_v16  ;;  %v672_v25 = vld [vmem:[%s3828_s1 + $0x20] sm:$0xff]  ;;  %v2283_v26 = vpack.c.bf16 %v721_v24, %v720_v23  ;;  %v673_v27 = vld [vmem:[%s3828_s1 + $0x28] sm:$0xff]  ;;  %v690_v31 = vld [vmem:[%s3828_s1 + $0xb0] sm:$0xff]  ;;  %p2494_p4 = pnand %p2493_p2, %p2669_p3 }
  0x5d   : > { %v704_v28 = vld [vmem:[%s3828_s1 + $0x120] sm:$0xff]  ;;  %v705_v29 = vld [vmem:[%s3828_s1 + $0x128] sm:$0xff]  ;;  %v2253_v30 = vpack.c.bf16 %v673_v27, %v672_v25  ;;  %v691_v32 = vld [vmem:[%s3828_s1 + $0xb8] sm:$0xff] }
  0x5e   : > { %2250 = vmatpush3.bf16.msra.mxu0 %v2249_v17  ;;  %v722_v33 = vld [vmem:[%s3828_s1 + $0x1b0] sm:$0xff]  ;;  %v2285_v34 = vpack.c.bf16 %v705_v29, %v704_v28  ;;  %v2255_v35 = vpack.c.bf16 %v691_v32, %v690_v31  ;;  %v723_v36 = vld [vmem:[%s3828_s1 + $0x1b8] sm:$0xff]  ;;  %v692_v42 = vld [vmem:[%s3828_s1 + $0xc0] sm:$0xff]  ;;  %p2495_p5 = pneg %p2494_p4 }
  0x5f   : > { %2282 = vmatpush3.bf16.msra.mxu1 %v2281_v21  ;;  %2252 = vmatprep.subr.bf16.mxu0 %v2251_v22  ;;  %v674_v37 = vld [vmem:[%s3828_s1 + $0x30] sm:$0xff]  ;;  %v675_v38 = vld [vmem:[%s3828_s1 + $0x38] sm:$0xff]  ;;  %v2287_v39 = vpack.c.bf16 %v723_v36, %v722_v33  ;;  %v693_v43 = vld [vmem:[%s3828_s1 + $0xc8] sm:$0xff] }
  0x60   : > { %2284 = vmatprep.subr.bf16.mxu1 %v2283_v26  ;;  %v706_v40 = vld [vmem:[%s3828_s1 + $0x130] sm:$0xff]  ;;  %v707_v41 = vld [vmem:[%s3828_s1 + $0x138] sm:$0xff]  ;;  %v724_v44 = vld [vmem:[%s3828_s1 + $0x1c0] sm:$0xff]  ;;  %v2257_v46 = vpack.c.bf16 %v675_v38, %v674_v37  ;;  %v2259_v48 = vpack.c.bf16 %v693_v43, %v692_v42 }
  0x61   : > { %v725_v45 = vld [vmem:[%s3828_s1 + $0x1c8] sm:$0xff]  ;;  %v2289_v47 = vpack.c.bf16 %v707_v41, %v706_v40  ;;  %v676_v49 = vld [vmem:[%s3828_s1 + $0x40] sm:$0xff]  ;;  %v694_v54 = vld [vmem:[%s3828_s1 + $0xd0] sm:$0xff] }
  0x62   : > { %2254 = vmatpush3.bf16.msra.mxu0 %v2253_v30  ;;  %v677_v50 = vld [vmem:[%s3828_s1 + $0x48] sm:$0xff]  ;;  %v708_v51 = vld [vmem:[%s3828_s1 + $0x140] sm:$0xff]  ;;  %v2291_v52 = vpack.c.bf16 %v725_v45, %v724_v44  ;;  %v695_v55 = vld [vmem:[%s3828_s1 + $0xd8] sm:$0xff] }
  0x63   : > { %2286 = vmatpush3.bf16.msra.mxu1 %v2285_v34  ;;  %2256 = vmatprep.subr.bf16.mxu0 %v2255_v35  ;;  %v709_v53 = vld [vmem:[%s3828_s1 + $0x148] sm:$0xff]  ;;  %v726_v56 = vld [vmem:[%s3828_s1 + $0x1d0] sm:$0xff]  ;;  %v727_v57 = vld [vmem:[%s3828_s1 + $0x1d8] sm:$0xff]  ;;  %v2261_v58 = vpack.c.bf16 %v677_v50, %v676_v49  ;;  %v2263_v60 = vpack.c.bf16 %v695_v55, %v694_v54 }
  0x64   : > { %2288 = vmatprep.subr.bf16.mxu1 %v2287_v39  ;;  %v2293_v59 = vpack.c.bf16 %v709_v53, %v708_v51  ;;  %v678_v61 = vld [vmem:[%s3828_s1 + $0x50] sm:$0xff]  ;;  %v679_v62 = vld [vmem:[%s3828_s1 + $0x58] sm:$0xff]  ;;  %v2295_v0 = vpack.c.bf16 %v727_v57, %v726_v56  ;;  %v696_v2 = vld [vmem:[%s3828_s1 + $0xe0] sm:$0xff] }
  0x65   : > { %v710_v63 = vld [vmem:[%s3828_s1 + $0x150] sm:$0xff]  ;;  %v711_v1 = vld [vmem:[%s3828_s1 + $0x158] sm:$0xff]  ;;  %v697_v3 = vld [vmem:[%s3828_s1 + $0xe8] sm:$0xff]  ;;  %v2265_v6 = vpack.c.bf16 %v679_v62, %v678_v61 }
  0x66   : > { %2258 = vmatpush3.bf16.msra.mxu0 %v2257_v46  ;;  %v728_v4 = vld [vmem:[%s3828_s1 + $0x1e0] sm:$0xff]  ;;  %v729_v5 = vld [vmem:[%s3828_s1 + $0x1e8] sm:$0xff]  ;;  %v2297_v10 = vpack.c.bf16 %v711_v1, %v710_v63  ;;  %v2267_v11 = vpack.c.bf16 %v697_v3, %v696_v2  ;;  %v698_v16 = vld [vmem:[%s3828_s1 + $0xf0] sm:$0xff] }
  0x67   : > { %2290 = vmatpush3.bf16.msra.mxu1 %v2289_v47  ;;  %2260 = vmatprep.subr.bf16.mxu0 %v2259_v48  ;;  %v680_v7 = vld [vmem:[%s3828_s1 + $0x60] sm:$0xff]  ;;  %v681_v8 = vld [vmem:[%s3828_s1 + $0x68] sm:$0xff]  ;;  %v2299_v15 = vpack.c.bf16 %v729_v5, %v728_v4  ;;  %v699_v17 = vld [vmem:[%s3828_s1 + $0xf8] sm:$0xff] }
  0x68   : > { %2292 = vmatprep.subr.bf16.mxu1 %v2291_v52  ;;  %v712_v9 = vld [vmem:[%s3828_s1 + $0x160] sm:$0xff]  ;;  %v713_v12 = vld [vmem:[%s3828_s1 + $0x168] sm:$0xff]  ;;  %v730_v21 = vld [vmem:[%s3828_s1 + $0x1f0] sm:$0xff]  ;;  %v2269_v23 = vpack.c.bf16 %v681_v8, %v680_v7  ;;  %v2271_v26 = vpack.c.bf16 %v699_v17, %v698_v16 }
  0x69   : > { %v3019_v13 = vld [vmem:[%s2847_s30] sm:$0xff]  ;;  %v3022_v14 = vld [vmem:[%s2847_s30 + $0x8] sm:$0xff]  ;;  %v3033_v20 = vld [vmem:[%s2847_s30 + $0x18] sm:$0xff]  ;;  %v2301_v25 = vpack.c.bf16 %v713_v12, %v712_v9 }
  0x6a   : > { %2262 = vmatpush3.bf16.msra.mxu0 %v2261_v58  ;;  %v521_v18 = vrot.slane %v3019_v13, 1  ;;  %v522_v19 = vrot.slane %v3022_v14, 1  ;;  %v731_v22 = vld [vmem:[%s3828_s1 + $0x1f8] sm:$0xff]  ;;  %1021 = vmatprep.mubr.f32.mxu1 %v3033_v20  ;;  %v682_v27 = vld [vmem:[%s3828_s1 + $0x70] sm:$0xff]  ;;  %v748_v32 = vld [vmem:[%s3828_s1 + $0x280] sm:$0xff]  ;;  %v578_v39 = vrot.slane %v3019_v13, 2 }
  0x6b   : > { %2294 = vmatpush3.bf16.msra.mxu1 %v2293_v59  ;;  %2264 = vmatprep.subr.bf16.mxu0 %v2263_v60  ;;  %v683_v28 = vld [vmem:[%s3828_s1 + $0x78] sm:$0xff]  ;;  %v714_v29 = vld [vmem:[%s3828_s1 + $0x170] sm:$0xff]  ;;  %v2303_v30 = vpack.c.bf16 %v731_v22, %v730_v21  ;;  %v749_v33 = vld [vmem:[%s3828_s1 + $0x288] sm:$0xff]  ;;  %v579_v40 = vrot.slane %v3022_v14, 2  ;;  %v526_v52 = vrot.slane %v3033_v20, 1  ;;  %v583_v5 = vrot.slane %v3033_v20, 2 }
  0x6c   : > { %2296 = vmatprep.subr.bf16.mxu1 %v2295_v0  ;;  %v523_v24 = vsel %vm520_vm0, %v521_v18, %v522_v19  ;;  %v715_v31 = vld [vmem:[%s3828_s1 + $0x178] sm:$0xff]  ;;  %v780_v34 = vld [vmem:[%s3828_s1 + $0x380] sm:$0xff]  ;;  %v781_v35 = vld [vmem:[%s3828_s1 + $0x388] sm:$0xff]  ;;  %v2273_v37 = vpack.c.bf16 %v683_v28, %v682_v27  ;;  %v2307_v41 = vpack.c.bf16 %v749_v33, %v748_v32 }
  0x6d   : > { %876 = vmatprep.mubr.f32.mxu0 %v523_v24  ;;  %v468_v36 = vld [vmem:[%s2847_s30 + $0x10] sm:$0x3]  ;;  %v2305_v38 = vpack.c.bf16 %v715_v31, %v714_v29  ;;  %v733_v43 = vld [vmem:[%s3828_s1 + $0x208] sm:$0xff]  ;;  %v2339_v44 = vpack.c.bf16 %v781_v35, %v780_v34  ;;  %v3083_v48 = vld [vmem:[%s2847_s30 + $0x20] sm:$0xff]  ;;  %v580_v55 = vsel %vm577_vm1, %v578_v39, %v579_v40 }
  0x6e   : > { %2266 = vmatpush3.bf16.msra.mxu0 %v2265_v6  ;;  %v732_v42 = vld [vmem:[%s3828_s1 + $0x200] sm:$0xff]  ;;  %v765_v46 = vld [vmem:[%s3828_s1 + $0x308] sm:$0xff]  ;;  %v524_v47 = vrot.slane %v468_v36, 1  ;;  %v750_v49 = vld [vmem:[%s3828_s1 + $0x290] sm:$0xff]  ;;  %v581_v57 = vrot.slane %v468_v36, 2  ;;  %v527_v58 = vrot.slane %v3083_v48, 1 }
  0x6f   : > { %2298 = vmatpush3.bf16.msra.mxu1 %v2297_v10  ;;  %2268 = vmatprep.subr.bf16.mxu0 %v2267_v11  ;;  %v764_v45 = vld [vmem:[%s3828_s1 + $0x300] sm:$0xff]  ;;  %v751_v50 = vld [vmem:[%s3828_s1 + $0x298] sm:$0xff]  ;;  %v2309_v51 = vpack.c.bf16 %v733_v43, %v732_v42  ;;  %v782_v53 = vld [vmem:[%s3828_s1 + $0x390] sm:$0xff]  ;;  %v584_v6 = vrot.slane %v3083_v48, 2 }
  0x70   : > { %2300 = vmatprep.subr.bf16.mxu1 %v2299_v15  ;;  %v783_v54 = vld [vmem:[%s3828_s1 + $0x398] sm:$0xff]  ;;  %v2341_v56 = vpack.c.bf16 %v765_v46, %v764_v45  ;;  %v734_v59 = vld [vmem:[%s3828_s1 + $0x210] sm:$0xff]  ;;  %v525_v60 = vsel %vm520_vm0, %v522_v19, %v524_v47  ;;  %v2311_v61 = vpack.c.bf16 %v751_v50, %v750_v49  ;;  %v752_v3 = vld [vmem:[%s3828_s1 + $0x2a0] sm:$0xff]  ;;  %v582_v9 = vsel %vm577_vm1, %v579_v40, %v581_v57 }
  0x71   : > { %v735_v62 = vld [vmem:[%s3828_s1 + $0x218] sm:$0xff]  ;;  %v766_v63 = vld [vmem:[%s3828_s1 + $0x310] sm:$0xff]  ;;  %v2343_v1 = vpack.c.bf16 %v783_v54, %v782_v53  ;;  %v753_v4 = vld [vmem:[%s3828_s1 + $0x2a8] sm:$0xff]  ;;  %v3133_v10 = vsel %vm520_vm0, %v526_v52, %v527_v58 }
  0x72   : > { %2270 = vmatpush3.bf16.msra.mxu0 %v2269_v23  ;;  %v3111_v0 = vld [vmem:[%s2847_s30 + $0x28] sm:$0x3]  ;;  %v784_v7 = vld [vmem:[%s3828_s1 + $0x3a0] sm:$0xff]  ;;  %v2313_v12 = vpack.c.bf16 %v735_v62, %v734_v59  ;;  %v3140_v15 = vld [vmem:[%s2847_s30 + $0x38] sm:$0xff]  ;;  %v2315_v17 = vpack.c.bf16 %v753_v4, %v752_v3 }
  0x73   : > { %2302 = vmatpush3.bf16.msra.mxu1 %v2301_v25  ;;  %2272 = vmatprep.subr.bf16.mxu0 %v2271_v26  ;;  %v767_v2 = vld [vmem:[%s3828_s1 + $0x318] sm:$0xff]  ;;  %v785_v8 = vld [vmem:[%s3828_s1 + $0x3a8] sm:$0xff]  ;;  %v3136_v11 = vld [vmem:[%s2847_s30 + $0x30] sm:$0xff]  ;;  %v532_v31 = vrot.slane %v3140_v15, 1  ;;  %v589_v43 = vrot.slane %v3140_v15, 2 }
  0x74   : > { %2304 = vmatprep.subr.bf16.mxu1 %v2303_v30  ;;  %v2345_v16 = vpack.c.bf16 %v767_v2, %v766_v63  ;;  %v736_v18 = vld [vmem:[%s3828_s1 + $0x220] sm:$0xff]  ;;  %v737_v19 = vld [vmem:[%s3828_s1 + $0x228] sm:$0xff]  ;;  %v2347_v22 = vpack.c.bf16 %v785_v8, %v784_v7  ;;  %v754_v24 = vld [vmem:[%s3828_s1 + $0x2b0] sm:$0xff]  ;;  %v531_v26 = vrot.slane %v3136_v11, 1  ;;  %v586_v30 = vrot.slane %v3111_v0, 2 }
  0x75   : > { %v768_v21 = vld [vmem:[%s3828_s1 + $0x320] sm:$0xff]  ;;  %v769_v23 = vld [vmem:[%s3828_s1 + $0x328] sm:$0xff]  ;;  %v755_v25 = vld [vmem:[%s3828_s1 + $0x2b8] sm:$0xff]  ;;  %v2317_v32 = vpack.c.bf16 %v737_v19, %v736_v18 }
  0x76   : > { %2274 = vmatpush3.bf16.msra.mxu0 %v2273_v37  ;;  %v786_v27 = vld [vmem:[%s3828_s1 + $0x3b0] sm:$0xff]  ;;  %v787_v28 = vld [vmem:[%s3828_s1 + $0x3b8] sm:$0xff]  ;;  %v2349_v34 = vpack.c.bf16 %v769_v23, %v768_v21  ;;  %v2319_v35 = vpack.c.bf16 %v755_v25, %v754_v24  ;;  %v757_v42 = vld [vmem:[%s3828_s1 + $0x2c8] sm:$0xff]  ;;  %v3213_v46 = vsel %vm577_vm1, %v584_v6, %v586_v30  ;;  %v3216_v47 = vsel %vm520_vm0, %v531_v26, %v532_v31 }
  0x77   : > { %2306 = vmatpush3.bf16.msra.mxu1 %v2305_v38  ;;  %2308 = vmatprep.subr.bf16.mxu0 %v2307_v41  ;;  %v3180_v33 = vld [vmem:[%s2847_s30 + $0x40] sm:$0x3]  ;;  %v739_v37 = vld [vmem:[%s3828_s1 + $0x238] sm:$0xff]  ;;  %v2351_v39 = vpack.c.bf16 %v787_v28, %v786_v27  ;;  %v789_v45 = vld [vmem:[%s3828_s1 + $0x3c8] sm:$0xff] }
  0x78   : > { %2340 = vmatprep.subr.bf16.mxu1 %v2339_v44  ;;  %v738_v36 = vld [vmem:[%s3828_s1 + $0x230] sm:$0xff]  ;;  %v771_v40 = vld [vmem:[%s3828_s1 + $0x338] sm:$0xff]  ;;  %v756_v41 = vld [vmem:[%s3828_s1 + $0x2c0] sm:$0xff]  ;;  %v534_v50 = vrot.slane %v3180_v33, 1  ;;  %v591_v2 = vrot.slane %v3180_v33, 2 }
  0x79   : > { %877 = vmatmul.mubr.f32.vlgmr.msra.gmra.mrb[0].mxu0 %v3019_v13  ;;  %v529_v13 = vrot.slane %v3111_v0, 1  ;;  %v770_v38 = vld [vmem:[%s3828_s1 + $0x330] sm:$0xff]  ;;  %v788_v44 = vld [vmem:[%s3828_s1 + $0x3c0] sm:$0xff]  ;;  %v3219_v49 = vld [vmem:[%s2847_s30 + $0x48] sm:$0xff]  ;;  %v2321_v52 = vpack.c.bf16 %v739_v37, %v738_v36  ;;  %v2323_v54 = vpack.c.bf16 %v757_v42, %v756_v41 }
  0x7a   : > { %1022 = vmatmul.mubr.f32.vlgmr.msra.gmra.mrb[0].mxu1 %v580_v55  ;;  %2310 = vmatpush3.bf16.msra.mxu0 %v2309_v51  ;;  %v3223_v51 = vld [vmem:[%s2847_s30 + $0x50] sm:$0xff]  ;;  %v2353_v53 = vpack.c.bf16 %v771_v40, %v770_v38  ;;  %v773_v59 = vld [vmem:[%s3828_s1 + $0x348] sm:$0xff]  ;;  %v536_v62 = vrot.slane %v3219_v49, 1  ;;  %v791_v0 = vld [vmem:[%s3828_s1 + $0x3d8] sm:$0xff]  ;;  %v593_v19 = vrot.slane %v3219_v49, 2  ;;  %v3296_v24 = vsel %vm577_vm1, %v589_v43, %v591_v2 }
  0x7b   : > { %2342 = vmatpush3.bf16.msra.mxu1 %v2341_v56  ;;  %881 = vmatprep.mubr.f32.mxu0 %v525_v60  ;;  %v3175_v29 = vsel %vm520_vm0, %v527_v58, %v529_v13  ;;  %v740_v55 = vld [vmem:[%s3828_s1 + $0x240] sm:$0xff]  ;;  %v741_v56 = vld [vmem:[%s3828_s1 + $0x248] sm:$0xff]  ;;  %v2355_v58 = vpack.c.bf16 %v789_v45, %v788_v44  ;;  %v758_v60 = vld [vmem:[%s3828_s1 + $0x2d0] sm:$0xff]  ;;  %v537_v3 = vrot.slane %v3223_v51, 1  ;;  %v594_v21 = vrot.slane %v3223_v51, 2 }
  0x7c   : > { %1026 = vmatprep.mubr.f32.mxu1 %v3083_v48  ;;  %2312 = vmatprep.subr.bf16.mxu0 %v2311_v61  ;;  %v772_v57 = vld [vmem:[%s3828_s1 + $0x340] sm:$0xff]  ;;  %v759_v61 = vld [vmem:[%s3828_s1 + $0x2d8] sm:$0xff]  ;;  %v790_v63 = vld [vmem:[%s3828_s1 + $0x3d0] sm:$0xff] }
  0x7d   : > { %882 = vmatmul.mubr.f32.gmra.mrb[2].mxu0 %v3022_v14  ;;  %2344 = vmatprep.subr.bf16.mxu1 %v2343_v1  ;;  %v3164_v14 = vsel %vm577_vm1, %v583_v5, %v584_v6  ;;  %v3258_v1 = vsel %vm520_vm0, %v532_v31, %v534_v50  ;;  %v3263_v4 = vld [vmem:[%s2847_s30 + $0x58] sm:$0x3]  ;;  %v2325_v5 = vpack.c.bf16 %v741_v56, %v740_v55  ;;  %v742_v8 = vld [vmem:[%s3828_s1 + $0x250] sm:$0xff]  ;;  %v3306_v28 = vld [vmem:[%s2847_s30 + $0x68] sm:$0xff] }
  0x7e   : > { %1027 = vmatmul.mubr.f32.gmra.mrb[2].mxu1 %v582_v9  ;;  %886 = vmatprep.mubr.f32.mxu0 %v3133_v10  ;;  %v2357_v6 = vpack.c.bf16 %v773_v59, %v772_v57  ;;  %v2327_v7 = vpack.c.bf16 %v759_v61, %v758_v60  ;;  %v743_v9 = vld [vmem:[%s3828_s1 + $0x258] sm:$0xff]  ;;  %v2359_v13 = vpack.c.bf16 %v791_v0, %v790_v63  ;;  %v761_v18 = vld [vmem:[%s3828_s1 + $0x2e8] sm:$0xff]  ;;  %v3302_v26 = vld [vmem:[%s2847_s30 + $0x60] sm:$0xff]  ;;  %v539_v27 = vrot.slane %v3263_v4, 1 }
  0x7f   : > { %1031 = vmatprep.mubr.f32.mxu1 %v3136_v11  ;;  %2314 = vmatpush3.bf16.msra.mxu0 %v2313_v12  ;;  %v774_v12 = vld [vmem:[%s3828_s1 + $0x350] sm:$0xff]  ;;  %v793_v23 = vld [vmem:[%s3828_s1 + $0x3e8] sm:$0xff]  ;;  %v3299_v25 = vsel %vm520_vm0, %v536_v62, %v537_v3  ;;  %v2329_v30 = vpack.c.bf16 %v743_v9, %v742_v8  ;;  %v744_v33 = vld [vmem:[%s3828_s1 + $0x260] sm:$0xff]  ;;  %v3330_v40 = vsel %vm577_vm1, %v593_v19, %v594_v21  ;;  %v541_v41 = vrot.slane %v3302_v26, 1 }
  0x80   : > { %2346 = vmatpush3.bf16.msra.mxu1 %v2345_v16  ;;  %2316 = vmatprep.subr.bf16.mxu0 %v2315_v17  ;;  %v775_v16 = vld [vmem:[%s3828_s1 + $0x358] sm:$0xff]  ;;  %v760_v17 = vld [vmem:[%s3828_s1 + $0x2e0] sm:$0xff]  ;;  %v777_v37 = vld [vmem:[%s3828_s1 + $0x368] sm:$0xff]  ;;  %v596_v44 = vrot.slane %v3263_v4, 2  ;;  %v542_v45 = vrot.slane %v3306_v28, 1  ;;  %v598_v62 = vrot.slane %v3302_v26, 2 }
  0x81   : > { %887 = vmatmul.mubr.f32.gmra.mrb[4].mxu0 %v3033_v20  ;;  %2348 = vmatprep.subr.bf16.mxu1 %v2347_v22  ;;  %v588_v20 = vrot.slane %v3136_v11, 2  ;;  %v792_v22 = vld [vmem:[%s3828_s1 + $0x3e0] sm:$0xff]  ;;  %v2361_v31 = vpack.c.bf16 %v775_v16, %v774_v12  ;;  %v762_v38 = vld [vmem:[%s3828_s1 + $0x2f0] sm:$0xff]  ;;  %v747_v56 = vld [vmem:[%s3828_s1 + $0x278] sm:$0xff]  ;;  %v599_v63 = vrot.slane %v3306_v28, 2 }
  0x82   : > { %1032 = vmatmul.mubr.f32.gmra.mrb[4].mxu1 %v3164_v14  ;;  %891 = vmatprep.mubr.f32.mxu0 %v3175_v29  ;;  %v2363_v36 = vpack.c.bf16 %v793_v23, %v792_v22  ;;  %v794_v42 = vld [vmem:[%s3828_s1 + $0x3f0] sm:$0xff]  ;;  %v779_v59 = vld [vmem:[%s3828_s1 + $0x378] sm:$0xff]  ;;  %v796_v60 = vld [vmem:[%s3828_s1 + $0x400] sm:$0xff]  ;;  %v3371_v0 = vsel %vm577_vm1, %v594_v21, %v596_v44  ;;  %v3374_v2 = vsel %vm520_vm0, %v541_v41, %v542_v45 }
  0x83   : > { %1036 = vmatprep.mubr.f32.mxu1 %v3140_v15  ;;  %2318 = vmatpush3.bf16.msra.mxu0 %v2317_v32  ;;  %v2331_v32 = vpack.c.bf16 %v761_v18, %v760_v17  ;;  %v480_v50 = vld [vmem:[%s2847_s30 + $0x70] sm:$0x3]  ;;  %v797_v61 = vld [vmem:[%s3828_s1 + $0x408] sm:$0xff]  ;;  %v3390_v12 = vsel %vm577_vm1, %v598_v62, %v599_v63  ;;  %v3474_v62 = vld [vmem:[%s2847_s30 + $0xc0] sm:$0xff] }
  0x84   : > { %2350 = vmatpush3.bf16.msra.mxu1 %v2349_v34  ;;  %2320 = vmatprep.subr.bf16.mxu0 %v2319_v35  ;;  %v745_v34 = vld [vmem:[%s3828_s1 + $0x268] sm:$0xff]  ;;  %v776_v35 = vld [vmem:[%s3828_s1 + $0x360] sm:$0xff]  ;;  %v746_v55 = vld [vmem:[%s3828_s1 + $0x270] sm:$0xff]  ;;  %v3382_v8 = vpack.c.bf16 %v797_v61, %v796_v60  ;;  %v601_v16 = vrot.slane %v480_v50, 2 }
  0x85   : > { %892 = vmatmul.mubr.f32.gmra.mrb[6].mxu0 %v3083_v48  ;;  %2352 = vmatprep.subr.bf16.mxu1 %v2351_v39  ;;  %v3247_v48 = vsel %vm577_vm1, %v588_v20, %v589_v43  ;;  %v763_v39 = vld [vmem:[%s3828_s1 + $0x2f8] sm:$0xff]  ;;  %v3341_v43 = vsel %vm520_vm0, %v537_v3, %v539_v27  ;;  %v778_v57 = vld [vmem:[%s3828_s1 + $0x370] sm:$0xff]  ;;  %v544_v3 = vrot.slane %v480_v50, 1  ;;  %v2337_v4 = vpack.c.bf16 %v747_v56, %v746_v55 }
  0x86   : > { %1037 = vmatmul.mubr.f32.gmra.mrb[6].mxu1 %v3213_v46  ;;  %896 = vmatprep.mubr.f32.mxu0 %v3216_v47  ;;  %v795_v20 = vld [vmem:[%s3828_s1 + $0x3f8] sm:$0xff]  ;;  %v3405_v21 = vsel %vm577_vm1, %v599_v63, %v601_v16  ;;  %v798_v16 = vld [vmem:[%s3828_s1 + $0x410] sm:$0xff] }
  0x87   : > { %1041 = vmatprep.mubr.f32.mxu1 %v3219_v49  ;;  %2322 = vmatpush3.bf16.msra.mxu0 %v2321_v52  ;;  %v2333_v52 = vpack.c.bf16 %v745_v34, %v744_v33  ;;  %v483_v18 = vld [vmem:[%s2847_s30 + $0x88] sm:$0x3]  ;;  %v489_v56 = vld [vmem:[%s2847_s30 + $0xb8] sm:$0x3] }
  0x88   : > { %2354 = vmatpush3.bf16.msra.mxu1 %v2353_v53  ;;  %2324 = vmatprep.subr.bf16.mxu0 %v2323_v54  ;;  %v2365_v53 = vpack.c.bf16 %v777_v37, %v776_v35  ;;  %v2335_v54 = vpack.c.bf16 %v763_v39, %v762_v38  ;;  %v549_v27 = vrot.slane %v483_v18, 1  ;;  %v606_v35 = vrot.slane %v483_v18, 2  ;;  %v486_v37 = vld [vmem:[%s2847_s30 + $0xa0] sm:$0x3]  ;;  %v3443_v44 = vld [vmem:[%s2847_s30 + $0xa8] sm:$0xff] }
  0x89   : > { %897 = vmatmul.mubr.f32.gmra.mrb[8].mxu0 %v3136_v11  ;;  %2356 = vmatprep.subr.bf16.mxu1 %v2355_v58  ;;  %v2367_v58 = vpack.c.bf16 %v795_v20, %v794_v42  ;;  %v554_v20 = vrot.slane %v486_v37, 1  ;;  %v556_v50 = vrot.slane %v3443_v44, 1  ;;  %v559_v61 = vrot.slane %v489_v56, 1 }
  0x8a   : > { %1042 = vmatmul.mubr.f32.gmra.mrb[8].mxu1 %v3247_v48  ;;  %901 = vmatprep.mubr.f32.mxu0 %v3258_v1 }
  0x8b   : > { %1046 = vmatprep.mubr.f32.mxu1 %v3223_v51  ;;  %2326 = vmatpush3.bf16.msra.mxu0 %v2325_v5  ;;  %v3377_v5 = vld [vmem:[%s2847_s30 + $0x78] sm:$0xff] }
  0x8c   : > { %2358 = vmatpush3.bf16.msra.mxu1 %v2357_v6  ;;  %2328 = vmatprep.subr.bf16.mxu0 %v2327_v7  ;;  %v3380_v6 = vld [vmem:[%s2847_s30 + $0x80] sm:$0xff]  ;;  %v2369_v7 = vpack.c.bf16 %v779_v59, %v778_v57  ;;  %v546_v9 = vrot.slane %v3377_v5, 1  ;;  %v603_v19 = vrot.slane %v3377_v5, 2  ;;  %v613_v57 = vrot.slane %v3443_v44, 2 }
  0x8d   : > { %902 = vmatmul.mubr.f32.gmra.mrb[10].mxu0 %v3140_v15  ;;  %2360 = vmatprep.subr.bf16.mxu1 %v2359_v13  ;;  %v3393_v13 = vsel %vm520_vm0, %v542_v45, %v544_v3  ;;  %v547_v17 = vrot.slane %v3380_v6, 1  ;;  %v604_v23 = vrot.slane %v3380_v6, 2  ;;  %v3446_v45 = vld [vmem:[%s2847_s30 + $0xb0] sm:$0xff] }
  0x8e   : > { %1047 = vmatmul.mubr.f32.gmra.mrb[10].mxu1 %v3296_v24  ;;  %906 = vmatprep.mubr.f32.mxu0 %v3299_v25  ;;  %v557_v55 = vrot.slane %v3446_v45, 1  ;;  %v614_v60 = vrot.slane %v3446_v45, 2 }
  0x8f   : > { %1051 = vmatprep.mubr.f32.mxu1 %v3302_v26  ;;  %2330 = vmatpush3.bf16.msra.mxu0 %v2329_v30  ;;  %v3408_v22 = vsel %vm520_vm0, %v546_v9, %v547_v17  ;;  %v3412_v30 = vld [vmem:[%s2847_s30 + $0x90] sm:$0xff]  ;;  %v3423_v33 = vsel %vm577_vm1, %v603_v19, %v604_v23  ;;  %v3426_v34 = vsel %vm520_vm0, %v547_v17, %v549_v27  ;;  %v799_v17 = vld [vmem:[%s3828_s1 + $0x418] sm:$0xff] }
  0x90   : > { %2362 = vmatpush3.bf16.msra.mxu1 %v2361_v31  ;;  %2332 = vmatprep.subr.bf16.mxu0 %v2331_v32  ;;  %v3415_v31 = vld [vmem:[%s2847_s30 + $0x98] sm:$0xff]  ;;  %v551_v32 = vrot.slane %v3412_v30, 1  ;;  %v608_v38 = vrot.slane %v3412_v30, 2  ;;  %v3436_v39 = vsel %vm577_vm1, %v604_v23, %v606_v35  ;;  %v3470_v59 = vsel %vm520_vm0, %v556_v50, %v557_v55  ;;  %v800_v19 = vld [vmem:[%s3828_s1 + $0x420] sm:$0xff] }
  0x91   : > { %907 = vmatmul.mubr.f32.gmra.mrb[12].mxu0 %v3219_v49  ;;  %2364 = vmatprep.subr.bf16.mxu1 %v2363_v36  ;;  %v552_v36 = vrot.slane %v3415_v31, 1  ;;  %v609_v42 = vrot.slane %v3415_v31, 2  ;;  %v3481_v63 = vsel %vm577_vm1, %v613_v57, %v614_v60  ;;  %v3484_v3 = vsel %vm520_vm0, %v557_v55, %v559_v61  ;;  %v801_v23 = vld [vmem:[%s3828_s1 + $0x428] sm:$0xff]  ;;  %v807_v27 = vld [vmem:[%s3828_s1 + $0x458] sm:$0xff] }
  0x92   : > { %1052 = vmatmul.mubr.f32.gmra.mrb[12].mxu1 %v3330_v40  ;;  %911 = vmatprep.mubr.f32.mxu0 %v3341_v43  ;;  %v2375_v18 = vpack.c.bf16 %v799_v17, %v798_v16  ;;  %v811_v35 = vld [vmem:[%s3828_s1 + $0x478] sm:$0xff] }
  0x93   : > { %1056 = vmatprep.mubr.f32.mxu1 %v3306_v28  ;;  %2334 = vmatpush3.bf16.msra.mxu0 %v2333_v52  ;;  %v3439_v41 = vsel %vm520_vm0, %v551_v32, %v552_v36  ;;  %v3454_v52 = vsel %vm577_vm1, %v608_v38, %v609_v42  ;;  %v809_v32 = vld [vmem:[%s3828_s1 + $0x468] sm:$0xff] }
  0x94   : > { %2366 = vmatpush3.bf16.msra.mxu1 %v2365_v53  ;;  %2336 = vmatprep.subr.bf16.mxu0 %v2335_v54  ;;  %v3457_v53 = vsel %vm520_vm0, %v552_v36, %v554_v20  ;;  %v611_v54 = vrot.slane %v486_v37, 2  ;;  %v495_v38 = vld [vmem:[%s2847_s30 + $0xe8] sm:$0x3] }
  0x95   : > { %912 = vmatmul.mubr.f32.gmra.mrb[14].mxu0 %v3223_v51  ;;  %2368 = vmatprep.subr.bf16.mxu1 %v2367_v58 }
  0x96   : > { %1057 = vmatmul.mubr.f32.gmra.mrb[14].mxu1 %v3371_v0  ;;  %916 = vmatprep.mubr.f32.mxu0 %v3374_v2  ;;  %v3467_v58 = vsel %vm577_vm1, %v609_v42, %v611_v54 }
  0x97   : > { %1061 = vmatprep.mubr.f32.mxu1 %v3377_v5  ;;  %2338 = vmatpush3.bf16.msra.mxu0 %v2337_v4  ;;  %v616_v4 = vrot.slane %v489_v56, 2 }
  0x98   : > { %2370 = vmatpush3.bf16.msra.mxu1 %v2369_v7  ;;  %2372 = vmatprep.subr.bf16.mxu0 %v3382_v8  ;;  %v3487_v7 = vld [vmem:[%s2847_s30 + $0xc8] sm:$0xff] }
  0x99   : > { %917 = vmatmul.mubr.f32.gmra.mrb[16].mxu0 %v3302_v26  ;;  %2403 = vmatprep.subr.bf16.mxu1 %v3382_v8  ;;  %v3494_v9 = vsel %vm577_vm1, %v614_v60, %v616_v4 }
  0x9a   : > { %1062 = vmatmul.mubr.f32.gmra.mrb[16].mxu1 %v3390_v12  ;;  %921 = vmatprep.mubr.f32.mxu0 %v3393_v13 }
  0x9b   : > { %1066 = vmatprep.mubr.f32.mxu1 %v3380_v6 }
  0x9d   : > { %922 = vmatmul.mubr.f32.gmra.mrb[18].mxu0 %v3306_v28 }
  0x9e   : > { %1067 = vmatmul.mubr.f32.gmra.mrb[18].mxu1 %v3405_v21  ;;  %926 = vmatprep.mubr.f32.mxu0 %v3408_v22 }
  0x9f   : > { %1071 = vmatprep.mubr.f32.mxu1 %v3412_v30 }
  0xa1   : > { %927 = vmatmul.mubr.f32.gmra.mrb[20].mxu0 %v3377_v5 }
  0xa2   : > { %1072 = vmatmul.mubr.f32.gmra.mrb[20].mxu1 %v3423_v33  ;;  %931 = vmatprep.mubr.f32.mxu0 %v3426_v34 }
  0xa3   : > { %1076 = vmatprep.mubr.f32.mxu1 %v3415_v31 }
  0xa5   : > { %932 = vmatmul.mubr.f32.gmra.mrb[22].mxu0 %v3380_v6 }
  0xa6   : > { %1077 = vmatmul.mubr.f32.gmra.mrb[22].mxu1 %v3436_v39  ;;  %936 = vmatprep.mubr.f32.mxu0 %v3439_v41 }
  0xa7   : > { %1081 = vmatprep.mubr.f32.mxu1 %v3443_v44 }
  0xa9   : > { %937 = vmatmul.mubr.f32.gmra.mrb[24].mxu0 %v3412_v30 }
  0xaa   : > { %1082 = vmatmul.mubr.f32.gmra.mrb[24].mxu1 %v3454_v52  ;;  %941 = vmatprep.mubr.f32.mxu0 %v3457_v53 }
  0xab   : > { %1086 = vmatprep.mubr.f32.mxu1 %v3446_v45 }
  0xad   : > { %942 = vmatmul.mubr.f32.gmra.mrb[26].mxu0 %v3415_v31 }
  0xae   : > { %1087 = vmatmul.mubr.f32.gmra.mrb[26].mxu1 %v3467_v58  ;;  %946 = vmatprep.mubr.f32.mxu0 %v3470_v59 }
  0xaf   : > { %1091 = vmatprep.mubr.f32.mxu1 %v3474_v62 }
  0xb1   : > { %947 = vmatmul.mubr.f32.gmra.mrb[28].mxu0 %v3443_v44 }
  0xb2   : > { %1092 = vmatmul.mubr.f32.gmra.mrb[28].mxu1 %v3481_v63  ;;  %951 = vmatprep.mubr.f32.mxu0 %v3484_v3 }
  0xb3   : > { %1096 = vmatprep.mubr.f32.mxu1 %v3487_v7 }
  0xb5   : > { %952 = vmatmul.mubr.f32.gmra.mrb[30].mxu0 %v3446_v45 }
  0xb6   : > { %1097 = vmatmul.mubr.f32.gmra.mrb[30].mxu1 %v3494_v9  ;;  %1166 = vmatprep.mubr.f32.mxu0 %v3164_v14  ;;  %v802_v14 = vld [vmem:[%s3828_s1 + $0x430] sm:$0xff] }
  0xb7   : > { %1311 = vmatprep.mubr.f32.mxu1 %v3216_v47 }
  0xb9   : > { %1167 = vmatmul.mubr.f32.vlgmr.msra.gmra.mrb[32].mxu0 %v3133_v10  ;;  %v2379_v10 = vpack.c.bf16 %v801_v23, %v800_v19 }
  0xba   : > { %1312 = vmatmul.mubr.f32.vlgmr.msra.gmra.mrb[32].mxu1 %v3136_v11  ;;  %2374 = vmatpush3.bf16.msra.mxu0 %v3382_v8  ;;  %v803_v11 = vld [vmem:[%s3828_s1 + $0x438] sm:$0xff] }
  0xbb   : > { %2411 = vmatpush3.bf16.msra.mxu1 %v3382_v8  ;;  %1171 = vmatprep.mubr.f32.mxu0 %v3213_v46  ;;  %v2383_v46 = vpack.c.bf16 %v803_v11, %v802_v14  ;;  %v805_v8 = vld [vmem:[%s3828_s1 + $0x448] sm:$0xff] }
  0xbc   : > { %1316 = vmatprep.mubr.f32.mxu1 %v3258_v1  ;;  %2376 = vmatprep.subr.bf16.mxu0 %v2375_v18 }
  0xbd   : > { %1172 = vmatmul.mubr.f32.gmra.mrb[34].mxu0 %v3175_v29  ;;  %2404 = vmatprep.subr.bf16.mxu1 %v2375_v18  ;;  %v804_v29 = vld [vmem:[%s3828_s1 + $0x440] sm:$0xff] }
  0xbe   : > { %1317 = vmatmul.mubr.f32.gmra.mrb[34].mxu1 %v3140_v15  ;;  %1176 = vmatprep.mubr.f32.mxu0 %v3247_v48  ;;  %v2387_v15 = vpack.c.bf16 %v805_v8, %v804_v29 }
  0xbf   : > { %1321 = vmatprep.mubr.f32.mxu1 %v3299_v25  ;;  %2378 = vmatpush3.bf16.msra.mxu0 %v2375_v18 }
  0xc0   : > { %2412 = vmatpush3.bf16.msra.mxu1 %v2375_v18  ;;  %2380 = vmatprep.subr.bf16.mxu0 %v2379_v10 }
  0xc1   : > { %1177 = vmatmul.mubr.f32.gmra.mrb[36].mxu0 %v3216_v47  ;;  %2405 = vmatprep.subr.bf16.mxu1 %v2379_v10  ;;  %v806_v47 = vld [vmem:[%s3828_s1 + $0x450] sm:$0xff] }
  0xc2   : > { %1322 = vmatmul.mubr.f32.gmra.mrb[36].mxu1 %v3219_v49  ;;  %1181 = vmatprep.mubr.f32.mxu0 %v3296_v24  ;;  %v2391_v49 = vpack.c.bf16 %v807_v27, %v806_v47 }
  0xc3   : > { %1326 = vmatprep.mubr.f32.mxu1 %v3341_v43  ;;  %2382 = vmatpush3.bf16.msra.mxu0 %v2379_v10 }
  0xc4   : > { %2413 = vmatpush3.bf16.msra.mxu1 %v2379_v10  ;;  %2384 = vmatprep.subr.bf16.mxu0 %v2383_v46 }
  0xc5   : > { %1182 = vmatmul.mubr.f32.gmra.mrb[38].mxu0 %v3258_v1  ;;  %2406 = vmatprep.subr.bf16.mxu1 %v2383_v46  ;;  %v808_v1 = vld [vmem:[%s3828_s1 + $0x460] sm:$0xff] }
  0xc6   : > { %1327 = vmatmul.mubr.f32.gmra.mrb[38].mxu1 %v3223_v51  ;;  %1186 = vmatprep.mubr.f32.mxu0 %v3330_v40  ;;  %v2395_v51 = vpack.c.bf16 %v809_v32, %v808_v1 }
  0xc7   : > { %1331 = vmatprep.mubr.f32.mxu1 %v3374_v2  ;;  %2386 = vmatpush3.bf16.msra.mxu0 %v2383_v46 }
  0xc8   : > { %2414 = vmatpush3.bf16.msra.mxu1 %v2383_v46  ;;  %2388 = vmatprep.subr.bf16.mxu0 %v2387_v15 }
  0xc9   : > { %1187 = vmatmul.mubr.f32.gmra.mrb[40].mxu0 %v3299_v25  ;;  %2407 = vmatprep.subr.bf16.mxu1 %v2387_v15  ;;  %v810_v25 = vld [vmem:[%s3828_s1 + $0x470] sm:$0xff] }
  0xca   : > { %1332 = vmatmul.mubr.f32.gmra.mrb[40].mxu1 %v3302_v26  ;;  %1191 = vmatprep.mubr.f32.mxu0 %v3371_v0  ;;  %v2399_v26 = vpack.c.bf16 %v811_v35, %v810_v25 }
  0xcb   : > { %1336 = vmatprep.mubr.f32.mxu1 %v3393_v13  ;;  %2390 = vmatpush3.bf16.msra.mxu0 %v2387_v15 }
  0xcc   : > { %2415 = vmatpush3.bf16.msra.mxu1 %v2387_v15  ;;  %2392 = vmatprep.subr.bf16.mxu0 %v2391_v49 }
  0xcd   : > { %1192 = vmatmul.mubr.f32.gmra.mrb[42].mxu0 %v3341_v43  ;;  %2408 = vmatprep.subr.bf16.mxu1 %v2391_v49  ;;  %v638_v43 = vrot.slane %v3487_v7, 1 }
  0xce   : > { %1337 = vmatmul.mubr.f32.gmra.mrb[42].mxu1 %v3306_v28  ;;  %1196 = vmatprep.mubr.f32.mxu0 %v3390_v12  ;;  %v637_v28 = vrot.slane %v3474_v62, 1 }
  0xcf   : > { %1341 = vmatprep.mubr.f32.mxu1 %v3408_v22  ;;  %2394 = vmatpush3.bf16.msra.mxu0 %v2391_v49 }
  0xd0   : > { %2416 = vmatpush3.bf16.msra.mxu1 %v2391_v49  ;;  %2396 = vmatprep.subr.bf16.mxu0 %v2395_v51 }
  0xd1   : > { %1197 = vmatmul.mubr.f32.gmra.mrb[44].mxu0 %v3374_v2  ;;  %2409 = vmatprep.subr.bf16.mxu1 %v2395_v51  ;;  %v492_v2 = vld [vmem:[%s2847_s30 + $0xd0] sm:$0x3] }
  0xd2   : > { %1342 = vmatmul.mubr.f32.gmra.mrb[44].mxu1 %v3377_v5  ;;  %1201 = vmatprep.mubr.f32.mxu0 %v3405_v21  ;;  %v639_v5 = vsel %vm520_vm0, %v637_v28, %v638_v43  ;;  %v647_v42 = vrot.slane %v492_v2, 2 }
  0xd3   : > { %1346 = vmatprep.mubr.f32.mxu1 %v3426_v34  ;;  %2398 = vmatpush3.bf16.msra.mxu0 %v2395_v51 }
  0xd4   : > { %2417 = vmatpush3.bf16.msra.mxu1 %v2395_v51  ;;  %2400 = vmatprep.subr.bf16.mxu0 %v2399_v26 }
  0xd5   : > { %1202 = vmatmul.mubr.f32.gmra.mrb[46].mxu0 %v3393_v13  ;;  %2410 = vmatprep.subr.bf16.mxu1 %v2399_v26  ;;  %v493_v13 = vld [vmem:[%s2847_s30 + $0xd8] sm:$0xff] }
  0xd6   : > { %1347 = vmatmul.mubr.f32.gmra.mrb[46].mxu1 %v3380_v6  ;;  %1206 = vmatprep.mubr.f32.mxu0 %v3423_v33  ;;  %v640_v6 = vrot.slane %v492_v2, 1  ;;  %v654_v36 = vrot.slane %v493_v13, 1 }
  0xd7   : > { %1351 = vmatprep.mubr.f32.mxu1 %v3439_v41  ;;  %2402 = vmatpush3.bf16.msra.mxu0 %v2399_v26 }
  0xd8   : > { %2418 = vmatpush3.bf16.msra.mxu1 %v2399_v26 }
  0xd9   : > { %1207 = vmatmul.mubr.f32.gmra.mrb[48].mxu0 %v3408_v22  ;;  %v494_v22 = vld [vmem:[%s2847_s30 + $0xe0] sm:$0xff]  ;;  %s2590_s30 = smov [#allocation4]  }
  0xda   : > { %1352 = vmatmul.mubr.f32.gmra.mrb[48].mxu1 %v3412_v30  ;;  %1211 = vmatprep.mubr.f32.mxu0 %v3436_v39  ;;  %v644_v30 = vrot.slane %v3474_v62, 2  ;;  %v655_v37 = vrot.slane %v494_v22, 1  ;;  %v662_v54 = vrot.slane %v494_v22, 2  ;;  %s2496_s8 = sshll.u32 %s2590_s30, 4  ;;  %s2497_s8 = int_to_ptr.vmem [resolvable:$false] %s2496_s8 }
  0xdb   : > { %1356 = vmatprep.mubr.f32.mxu1 %v3457_v53  ;;  %s2498_s24 = scalar_lea.vmem %s2497_s8, 4096  ;;  %p2499_p6 = scmp.lt.s32.totalorder %s3766_s5, %s2497_s8 }
  0xdc   : > { %v656_v20 = vsel %vm520_vm0, %v654_v36, %v655_v37  ;;  %p2500_p7 = scmp.lt.s32.totalorder %s2498_s24, %s2492_s12 }
  0xdd   : > { %1212 = vmatmul.mubr.f32.gmra.mrb[50].mxu0 %v3426_v34  ;;  %v641_v34 = vsel %vm520_vm0, %v638_v43, %v640_v6 }
  0xde   : > { %1357 = vmatmul.mubr.f32.gmra.mrb[50].mxu1 %v3415_v31  ;;  %1216 = vmatprep.mubr.f32.mxu0 %v3454_v52  ;;  %v645_v31 = vrot.slane %v3487_v7, 2  ;;  %p2501_p9 = por %p2500_p7, %p2499_p6 }
  0xdf   : > { %1361 = vmatprep.mubr.f32.mxu1 %v3470_v59 }
  0xe0   : > { %p2502_p10 = pnand %p2501_p9, %p2495_p5 }
  0xe1   : > { %1217 = vmatmul.mubr.f32.gmra.mrb[52].mxu0 %v3439_v41  ;;  %v646_v41 = vsel %vm577_vm1, %v644_v30, %v645_v31 }
  0xe2   : > { %1362 = vmatmul.mubr.f32.gmra.mrb[52].mxu1 %v3443_v44  ;;  %1221 = vmatprep.mubr.f32.mxu0 %v3467_v58  ;;  %v657_v44 = vrot.slane %v495_v38, 1 }
  0xe3   : > { %1366 = vmatprep.mubr.f32.mxu1 %v3484_v3 }
  0xe4   : > { %v658_v50 = vsel %vm520_vm0, %v655_v37, %v657_v44 }
  0xe5   : > { %1222 = vmatmul.mubr.f32.gmra.mrb[54].mxu0 %v3457_v53  ;;  %v661_v53 = vrot.slane %v493_v13, 2 }
  0xe6   : > { %1367 = vmatmul.mubr.f32.gmra.mrb[54].mxu1 %v3446_v45  ;;  %1226 = vmatprep.mubr.f32.mxu0 %v3481_v63  ;;  %v648_v45 = vsel %vm577_vm1, %v645_v31, %v647_v42 }
  0xe7   : > { %1371 = vmatprep.mubr.f32.mxu1 %v639_v5 }
  0xe9   : > { %1227 = vmatmul.mubr.f32.gmra.mrb[56].mxu0 %v3470_v59 }
  0xea   : > { %1372 = vmatmul.mubr.f32.gmra.mrb[56].mxu1 %v3474_v62  ;;  %1231 = vmatprep.mubr.f32.mxu0 %v3494_v9 }
  0xeb   : > { %1376 = vmatprep.mubr.f32.mxu1 %v641_v34 }
  0xed   : > { %1232 = vmatmul.mubr.f32.gmra.mrb[58].mxu0 %v3484_v3 }
  0xee   : > { %1377 = vmatmul.mubr.f32.gmra.mrb[58].mxu1 %v3487_v7  ;;  %1236 = vmatprep.mubr.f32.mxu0 %v646_v41 }
  0xef   : > { %1381 = vmatprep.mubr.f32.mxu1 %v656_v20 }
  0xf1   : > { %1237 = vmatmul.mubr.f32.gmra.mrb[60].mxu0 %v639_v5 }
  0xf2   : > { %1382 = vmatmul.mubr.f32.gmra.mrb[60].mxu1 %v493_v13  ;;  %1241 = vmatprep.mubr.f32.mxu0 %v648_v45 }
  0xf3   : > { %1386 = vmatprep.mubr.f32.mxu1 %v658_v50 }
  0xf5   : > { %1242 = vmatmul.mubr.f32.gmra.mrb[62].mxu0 %v641_v34 }
  0xf6   : > { %1387 = vmatmul.mubr.f32.gmra.mrb[62].mxu1 %v494_v22  ;;  %2219 = vmatprep.mubr.f32.mxu0 %v3247_v48  ;;  %v664_v48 = vrot.slane %v495_v38, 2 }
  0xf7   : > { %2231 = vmatprep.mubr.f32.mxu1 %v3454_v52  ;;  %v663_v52 = vsel %vm577_vm1, %v661_v53, %v662_v54 }
  0xf9   : > { %2220 = vmatmul.mubr.f32.vlgmr.msra.gmra.mrb[64].mxu0 %v3296_v24  ;;  %v665_v24 = vsel %vm577_vm1, %v662_v54, %v664_v48 }
  0xfa   : > { %2232 = vmatmul.mubr.f32.vlgmr.msra.gmra.mrb[64].mxu1 %v3467_v58  ;;  %2222 = vmatprep.mubr.f32.mxu0 %v3330_v40 }
  0xfb   : > { %2234 = vmatprep.mubr.f32.mxu1 %v3481_v63 }
  0xfd   : > { %2223 = vmatmul.mubr.f32.gmra.mrb[66].mxu0 %v3371_v0 }
  0xfe   : > { %2235 = vmatmul.mubr.f32.gmra.mrb[66].mxu1 %v3494_v9  ;;  %2225 = vmatprep.mubr.f32.mxu0 %v3390_v12 }
  0xff   : > { %2237 = vmatprep.mubr.f32.mxu1 %v646_v41 }
 0x101   : > { %2226 = vmatmul.mubr.f32.gmra.mrb[68].mxu0 %v3405_v21 }
 0x102   : > { %2238 = vmatmul.mubr.f32.gmra.mrb[68].mxu1 %v648_v45  ;;  %2228 = vmatprep.mubr.f32.mxu0 %v3423_v33 }
 0x103   : > { %2240 = vmatprep.mubr.f32.mxu1 %v663_v52 }
 0x105   : > { %2229 = vmatmul.mubr.f32.gmra.mrb[70].mxu0 %v3436_v39 }
 0x106   : > { %2241 = vmatmul.mubr.f32.gmra.mrb[70].mxu1 %v665_v24 }
 0x14c   : > { %v1867_v40 = vpop.f32.mrb[0].mxu0 }
 0x14d   : > { %v1947_v0 = vpop.f32.mrb[0].mxu1  ;;  %v1868_v55 = vpop.f32.mrb[1].mxu0 }
 0x14e   : > { %v1869_v56 = vadd.f32 %v1868_v55, %v1867_v40  ;;  %v1948_v12 = vpop.f32.mrb[1].mxu1 }
 0x14f   : > { %v1949_v57 = vadd.f32 %v1948_v12, %v1947_v0 }
 0x150   : > { %v1870_v58 = vpop.f32.mrb[2].mxu0 }
 0x151   : > { %v3624_v59 = vadd.f32 %v1949_v57, %v1869_v56  ;;  %v1950_v60 = vpop.f32.mrb[2].mxu1  ;;  %v1871_v21 = vpop.f32.mrb[3].mxu0 }
 0x152   : > { %v1872_v61 = vadd.f32 %v1871_v21, %v1870_v58  ;;  %v1951_v62 = vpop.f32.mrb[3].mxu1 }
 0x153   : > { %v1952_v33 = vadd.f32 %v1951_v62, %v1950_v60 }
 0x154   : > { %v1873_v63 = vpop.f32.mrb[4].mxu0 }
 0x155   : > { %v3626_v3 = vadd.f32 %v1952_v33, %v1872_v61  ;;  %v1953_v4 = vpop.f32.mrb[4].mxu1  ;;  %v1874_v39 = vpop.f32.mrb[5].mxu0 }
 0x156   : > { %v1875_v7 = vadd.f32 %v1874_v39, %v1873_v63  ;;  %v1954_v9 = vpop.f32.mrb[5].mxu1 }
 0x157   : > { %v1955_v16 = vadd.f32 %v1954_v9, %v1953_v4 }
 0x158   : > { %v1876_v17 = vpop.f32.mrb[6].mxu0 }
 0x159   : > { %v3628_v18 = vadd.f32 %v1955_v16, %v1875_v7  ;;  %v1956_v19 = vpop.f32.mrb[6].mxu1  ;;  %v1877_v23 = vpop.f32.mrb[7].mxu0 }
 0x15a   : > { %v1878_v10 = vadd.f32 %v1877_v23, %v1876_v17  ;;  %v1957_v14 = vpop.f32.mrb[7].mxu1 }
 0x15b   : > { %v1958_v11 = vadd.f32 %v1957_v14, %v1956_v19 }
 0x15c   : > { %v1879_v46 = vpop.f32.mrb[8].mxu0 }
 0x15d   : > { %v3630_v29 = vadd.f32 %v1958_v11, %v1878_v10  ;;  %v1959_v8 = vpop.f32.mrb[8].mxu1  ;;  %v1880_v15 = vpop.f32.mrb[9].mxu0 }
 0x15e   : > { %v1881_v47 = vadd.f32 %v1880_v15, %v1879_v46  ;;  %v1960_v27 = vpop.f32.mrb[9].mxu1 }
 0x15f   : > { %v1961_v49 = vadd.f32 %v1960_v27, %v1959_v8 }
 0x160   : > { %v1882_v1 = vpop.f32.mrb[10].mxu0 }
 0x161   : > { %v3632_v32 = vadd.f32 %v1961_v49, %v1881_v47  ;;  %v1962_v51 = vpop.f32.mrb[10].mxu1  ;;  %v1883_v25 = vpop.f32.mrb[11].mxu0 }
 0x162   : > { %v1884_v35 = vadd.f32 %v1883_v25, %v1882_v1  ;;  %v1963_v26 = vpop.f32.mrb[11].mxu1 }
 0x163   : > { %v1964_v28 = vadd.f32 %v1963_v26, %v1962_v51 }
 0x164   : > { %v1885_v43 = vpop.f32.mrb[12].mxu0 }
 0x165   : > { %v3634_v2 = vadd.f32 %v1964_v28, %v1884_v35  ;;  %v1965_v5 = vpop.f32.mrb[12].mxu1  ;;  %v1886_v6 = vpop.f32.mrb[13].mxu0 }
 0x166   : > { %v1887_v13 = vadd.f32 %v1886_v6, %v1885_v43  ;;  %v1966_v22 = vpop.f32.mrb[13].mxu1 }
 0x167   : > { %v1967_v30 = vadd.f32 %v1966_v22, %v1965_v5 }
 0x168   : > { %v1888_v31 = vpop.f32.mrb[14].mxu0 }
 0x169   : > { %v3636_v34 = vadd.f32 %v1967_v30, %v1887_v13  ;;  %v1968_v36 = vpop.f32.mrb[14].mxu1  ;;  %v1889_v37 = vpop.f32.mrb[15].mxu0 }
 0x16a   : > { %v1890_v38 = vadd.f32 %v1889_v37, %v1888_v31  ;;  %v1969_v41 = vpop.f32.mrb[15].mxu1 }
 0x16b   : > { %v1970_v42 = vadd.f32 %v1969_v41, %v1968_v36 }
 0x16c   : > { %v1891_v20 = vpop.f32.mrb[16].mxu0 }
 0x16d   : > { %v3638_v44 = vadd.f32 %v1970_v42, %v1890_v38  ;;  %v1971_v45 = vpop.f32.mrb[16].mxu1  ;;  %v1892_v50 = vpop.f32.mrb[17].mxu0 }
 0x16e   : > { %v1893_v53 = vadd.f32 %v1892_v50, %v1891_v20  ;;  %v1972_v54 = vpop.f32.mrb[17].mxu1 }
 0x16f   : > { %v1973_v48 = vadd.f32 %v1972_v54, %v1971_v45 }
 0x170   : > { %v1894_v52 = vpop.f32.mrb[18].mxu0 }
 0x171   : > { %v3640_v24 = vadd.f32 %v1973_v48, %v1893_v53  ;;  %v1974_v40 = vpop.f32.mrb[18].mxu1  ;;  %v1895_v0 = vpop.f32.mrb[19].mxu0 }
 0x172   : > { %v1896_v55 = vadd.f32 %v1895_v0, %v1894_v52  ;;  %v1975_v56 = vpop.f32.mrb[19].mxu1 }
 0x173   : > { %v1976_v12 = vadd.f32 %v1975_v56, %v1974_v40 }
 0x174   : > { %v1897_v57 = vpop.f32.mrb[20].mxu0 }
 0x175   : > { %v3642_v58 = vadd.f32 %v1976_v12, %v1896_v55  ;;  %v1977_v60 = vpop.f32.mrb[20].mxu1  ;;  %v1898_v21 = vpop.f32.mrb[21].mxu0 }
 0x176   : > { %v1899_v61 = vadd.f32 %v1898_v21, %v1897_v57  ;;  %v1978_v62 = vpop.f32.mrb[21].mxu1 }
 0x177   : > { %v1979_v33 = vadd.f32 %v1978_v62, %v1977_v60 }
 0x178   : > { %v1900_v63 = vpop.f32.mrb[22].mxu0 }
 0x179   : > { %v3644_v4 = vadd.f32 %v1979_v33, %v1899_v61  ;;  %v1980_v39 = vpop.f32.mrb[22].mxu1  ;;  %v1901_v7 = vpop.f32.mrb[23].mxu0 }
 0x17a   : > { %v1902_v9 = vadd.f32 %v1901_v7, %v1900_v63  ;;  %v1981_v16 = vpop.f32.mrb[23].mxu1 }
 0x17b   : > { %v1982_v17 = vadd.f32 %v1981_v16, %v1980_v39 }
 0x17c   : > { %v1903_v19 = vpop.f32.mrb[24].mxu0 }
 0x17d   : > { %v3646_v23 = vadd.f32 %v1982_v17, %v1902_v9  ;;  %v1983_v10 = vpop.f32.mrb[24].mxu1  ;;  %v1904_v14 = vpop.f32.mrb[25].mxu0 }
 0x17e   : > { %v1905_v11 = vadd.f32 %v1904_v14, %v1903_v19  ;;  %v1984_v46 = vpop.f32.mrb[25].mxu1 }
 0x17f   : > { %v1985_v8 = vadd.f32 %v1984_v46, %v1983_v10 }
 0x180   : > { %v1906_v15 = vpop.f32.mrb[26].mxu0 }
 0x181   : > { %v3648_v47 = vadd.f32 %v1985_v8, %v1905_v11  ;;  %v1986_v27 = vpop.f32.mrb[26].mxu1  ;;  %v1907_v49 = vpop.f32.mrb[27].mxu0 }
 0x182   : > { %v1908_v1 = vadd.f32 %v1907_v49, %v1906_v15  ;;  %v1987_v51 = vpop.f32.mrb[27].mxu1 }
 0x183   : > { %v1988_v25 = vadd.f32 %v1987_v51, %v1986_v27 }
 0x184   : > { %v1909_v35 = vpop.f32.mrb[28].mxu0 }
 0x185   : > { %v3650_v26 = vadd.f32 %v1988_v25, %v1908_v1  ;;  %v1989_v28 = vpop.f32.mrb[28].mxu1  ;;  %v1910_v43 = vpop.f32.mrb[29].mxu0 }
 0x186   : > { %v1911_v5 = vadd.f32 %v1910_v43, %v1909_v35  ;;  %v1990_v6 = vpop.f32.mrb[29].mxu1 }
 0x187   : > { %v1991_v13 = vadd.f32 %v1990_v6, %v1989_v28 }
 0x188   : > { %v1912_v22 = vpop.f32.mrb[30].mxu0 }
 0x189   : > { %v3652_v30 = vadd.f32 %v1991_v13, %v1911_v5  ;;  %v1992_v31 = vpop.f32.mrb[30].mxu1  ;;  %v1913_v36 = vpop.f32.mrb[31].mxu0 }
 0x18a   : > { %v1914_v37 = vadd.f32 %v1913_v36, %v1912_v22  ;;  %v1993_v38 = vpop.f32.mrb[31].mxu1 }
 0x18b   : > { %v1994_v41 = vadd.f32 %v1993_v38, %v1992_v31 }
 0x18c   : > { %v2027_v42 = vpop.f32.mrb[32].mxu0 }
 0x18d   : > { %v3654_v20 = vadd.f32 %v1994_v41, %v1914_v37  ;;  %v2107_v45 = vpop.f32.mrb[32].mxu1  ;;  %v2028_v50 = vpop.f32.mrb[33].mxu0 }
 0x18e   : > { %v2029_v53 = vadd.f32 %v2028_v50, %v2027_v42  ;;  %v2108_v54 = vpop.f32.mrb[33].mxu1 }
 0x18f   : > { %v2109_v48 = vadd.f32 %v2108_v54, %v2107_v45 }
 0x190   : > { %v1169_v52 = vadd.f32 %v2029_v53, %v3624_v59  ;;  %v2030_v40 = vpop.f32.mrb[34].mxu0 }
 0x191   : > { %v2110_v0 = vpop.f32.mrb[34].mxu1  ;;  %v2031_v55 = vpop.f32.mrb[35].mxu0 }
 0x192   : > { %v2032_v56 = vadd.f32 %v2031_v55, %v2030_v40  ;;  %v2111_v12 = vpop.f32.mrb[35].mxu1  ;;  %v3657_v57 = vadd.f32 %v2109_v48, %v1169_v52 }
 0x193   : > { %v2112_v60 = vadd.f32 %v2111_v12, %v2110_v0 }
 0x194   : > { %v1174_v21 = vadd.f32 %v2032_v56, %v3626_v3  ;;  %v2033_v61 = vpop.f32.mrb[36].mxu0 }
 0x195   : > { %v2113_v62 = vpop.f32.mrb[36].mxu1  ;;  %v2034_v33 = vpop.f32.mrb[37].mxu0 }
 0x196   : > { %v2035_v63 = vadd.f32 %v2034_v33, %v2033_v61  ;;  %v2114_v39 = vpop.f32.mrb[37].mxu1  ;;  %v3660_v7 = vadd.f32 %v2112_v60, %v1174_v21 }
 0x197   : > { %v2115_v9 = vadd.f32 %v2114_v39, %v2113_v62 }
 0x198   : > { %v1179_v59 = vadd.f32 %v2035_v63, %v3628_v18  ;;  %v2036_v16 = vpop.f32.mrb[38].mxu0 }
 0x199   : > { %v2116_v17 = vpop.f32.mrb[38].mxu1  ;;  %v2037_v19 = vpop.f32.mrb[39].mxu0 }
 0x19a   : > { %v2038_v10 = vadd.f32 %v2037_v19, %v2036_v16  ;;  %v2117_v14 = vpop.f32.mrb[39].mxu1  ;;  %v3663_v11 = vadd.f32 %v2115_v9, %v1179_v59 }
 0x19b   : > { %v2118_v46 = vadd.f32 %v2117_v14, %v2116_v17 }
 0x19c   : > { %v1184_v3 = vadd.f32 %v2038_v10, %v3630_v29  ;;  %v2039_v8 = vpop.f32.mrb[40].mxu0 }
 0x19d   : > { %v2119_v15 = vpop.f32.mrb[40].mxu1  ;;  %v2040_v27 = vpop.f32.mrb[41].mxu0 }
 0x19e   : > { %v2041_v49 = vadd.f32 %v2040_v27, %v2039_v8  ;;  %v2120_v1 = vpop.f32.mrb[41].mxu1  ;;  %v3666_v51 = vadd.f32 %v2118_v46, %v1184_v3 }
 0x19f   : > { %v2121_v25 = vadd.f32 %v2120_v1, %v2119_v15 }
 0x1a0   : > { %v1189_v18 = vadd.f32 %v2041_v49, %v3632_v32  ;;  %v2042_v35 = vpop.f32.mrb[42].mxu0 }
 0x1a1   : > { %v2122_v28 = vpop.f32.mrb[42].mxu1  ;;  %v2043_v43 = vpop.f32.mrb[43].mxu0 }
 0x1a2   : > { %v2044_v5 = vadd.f32 %v2043_v43, %v2042_v35  ;;  %v2123_v6 = vpop.f32.mrb[43].mxu1  ;;  %v3669_v13 = vadd.f32 %v2121_v25, %v1189_v18 }
 0x1a3   : > { %v2124_v22 = vadd.f32 %v2123_v6, %v2122_v28 }
 0x1a4   : > { %v1194_v29 = vadd.f32 %v2044_v5, %v3634_v2  ;;  %v2045_v31 = vpop.f32.mrb[44].mxu0 }
 0x1a5   : > { %v2125_v36 = vpop.f32.mrb[44].mxu1  ;;  %v2046_v37 = vpop.f32.mrb[45].mxu0 }
 0x1a6   : > { %v2047_v38 = vadd.f32 %v2046_v37, %v2045_v31  ;;  %v2126_v41 = vpop.f32.mrb[45].mxu1  ;;  %v3672_v42 = vadd.f32 %v2124_v22, %v1194_v29 }
 0x1a7   : > { %v2127_v45 = vadd.f32 %v2126_v41, %v2125_v36 }
 0x1a8   : > { %v1199_v32 = vadd.f32 %v2047_v38, %v3636_v34  ;;  %v2048_v50 = vpop.f32.mrb[46].mxu0 }
 0x1a9   : > { %v2128_v53 = vpop.f32.mrb[46].mxu1  ;;  %v2049_v54 = vpop.f32.mrb[47].mxu0 }
 0x1aa   : > { %v2050_v48 = vadd.f32 %v2049_v54, %v2048_v50  ;;  %v2129_v52 = vpop.f32.mrb[47].mxu1  ;;  %v3675_v40 = vadd.f32 %v2127_v45, %v1199_v32 }
 0x1ab   : > { %v2130_v0 = vadd.f32 %v2129_v52, %v2128_v53 }
 0x1ac   : > { %v1204_v2 = vadd.f32 %v2050_v48, %v3638_v44  ;;  %v2051_v55 = vpop.f32.mrb[48].mxu0 }
 0x1ad   : > { %v2131_v56 = vpop.f32.mrb[48].mxu1  ;;  %v2052_v12 = vpop.f32.mrb[49].mxu0 }
 0x1ae   : > { %v2053_v60 = vadd.f32 %v2052_v12, %v2051_v55  ;;  %v2132_v21 = vpop.f32.mrb[49].mxu1  ;;  %v3678_v61 = vadd.f32 %v2130_v0, %v1204_v2 }
 0x1af   : > { %v2133_v62 = vadd.f32 %v2132_v21, %v2131_v56 }
 0x1b0   : > { %v1209_v34 = vadd.f32 %v2053_v60, %v3640_v24  ;;  %v2054_v33 = vpop.f32.mrb[50].mxu0 }
 0x1b1   : > { %v2134_v63 = vpop.f32.mrb[50].mxu1  ;;  %v2055_v39 = vpop.f32.mrb[51].mxu0 }
 0x1b2   : > { %v2056_v9 = vadd.f32 %v2055_v39, %v2054_v33  ;;  %v2135_v59 = vpop.f32.mrb[51].mxu1  ;;  %v1354_v16 = vadd.f32 %v2133_v62, %v1209_v34 }
 0x1b3   : > { %v2136_v17 = vadd.f32 %v2135_v59, %v2134_v63 }
 0x1b4   : > { %v1214_v19 = vadd.f32 %v2056_v9, %v3642_v58  ;;  %v2057_v44 = vpop.f32.mrb[52].mxu0  ;;  %v3697_v9 = vld [vmem:[%s3829_s2] ss:$0 sm:$0xff] }
 0x1b5   : > { %v2137_v10 = vpop.f32.mrb[52].mxu1  ;;  %v2058_v14 = vpop.f32.mrb[53].mxu0 }
 0x1b6   : > { %v2059_v46 = vadd.f32 %v2058_v14, %v2057_v44  ;;  %v2138_v3 = vpop.f32.mrb[53].mxu1  ;;  %v1359_v8 = vadd.f32 %v2136_v17, %v1214_v19  ;;  %v3703_v19 = vld [vmem:[%s3830_s3] ss:$0 sm:$0xff] }
 0x1b7   : > { %v2139_v15 = vadd.f32 %v2138_v3, %v2137_v10 }
 0x1b8   : > { %v1219_v27 = vadd.f32 %v2059_v46, %v3644_v4  ;;  %v2060_v49 = vpop.f32.mrb[54].mxu0 }
 0x1b9   : > { %v2140_v24 = vpop.f32.mrb[54].mxu1  ;;  %v2061_v1 = vpop.f32.mrb[55].mxu0 }
 0x1ba   : > { %v2062_v25 = vadd.f32 %v2061_v1, %v2060_v49  ;;  %v2141_v18 = vpop.f32.mrb[55].mxu1  ;;  %v3683_v35 = vadd.f32 %v2139_v15, %v1219_v27 }
 0x1bb   : > { %v2142_v28 = vadd.f32 %v2141_v18, %v2140_v24 }
 0x1bc   : > { %v1224_v43 = vadd.f32 %v2062_v25, %v3646_v23  ;;  %v2063_v58 = vpop.f32.mrb[56].mxu0 }
 0x1bd   : > { %v2143_v5 = vpop.f32.mrb[56].mxu1  ;;  %v2064_v6 = vpop.f32.mrb[57].mxu0 }
 0x1be   : > { %v2065_v22 = vadd.f32 %v2064_v6, %v2063_v58  ;;  %v2144_v29 = vpop.f32.mrb[57].mxu1  ;;  %v1369_v31 = vadd.f32 %v2142_v28, %v1224_v43 }
 0x1bf   : > { %v2145_v36 = vadd.f32 %v2144_v29, %v2143_v5 }
 0x1c0   : > { %v1229_v37 = vadd.f32 %v2065_v22, %v3648_v47  ;;  %v2066_v4 = vpop.f32.mrb[58].mxu0 }
 0x1c1   : > { %v2146_v38 = vpop.f32.mrb[58].mxu1  ;;  %v2067_v41 = vpop.f32.mrb[59].mxu0 }
 0x1c2   : > { %v2068_v45 = vadd.f32 %v2067_v41, %v2066_v4  ;;  %v2147_v32 = vpop.f32.mrb[59].mxu1  ;;  %v3687_v50 = vadd.f32 %v2145_v36, %v1229_v37 }
 0x1c3   : > { %v2148_v53 = vadd.f32 %v2147_v32, %v2146_v38 }
 0x1c4   : > { %v1234_v54 = vadd.f32 %v2068_v45, %v3650_v26  ;;  %v2069_v23 = vpop.f32.mrb[60].mxu0 }
 0x1c5   : > { %v2149_v48 = vpop.f32.mrb[60].mxu1  ;;  %v2070_v52 = vpop.f32.mrb[61].mxu0 }
 0x1c6   : > { %v2071_v0 = vadd.f32 %v2070_v52, %v2069_v23  ;;  %v2150_v2 = vpop.f32.mrb[61].mxu1  ;;  %v1379_v55 = vadd.f32 %v2148_v53, %v1234_v54 }
 0x1c7   : > { %v2151_v56 = vadd.f32 %v2150_v2, %v2149_v48 }
 0x1c8   : > { %v1239_v12 = vadd.f32 %v2071_v0, %v3652_v30  ;;  %v2072_v47 = vpop.f32.mrb[62].mxu0 }
 0x1c9   : > { %v2152_v60 = vpop.f32.mrb[62].mxu1  ;;  %v2073_v21 = vpop.f32.mrb[63].mxu0 }
 0x1ca   : > { %v2074_v62 = vadd.f32 %v2073_v21, %v2072_v47  ;;  %v2153_v34 = vpop.f32.mrb[63].mxu1  ;;  %v3691_v33 = vadd.f32 %v2151_v56, %v1239_v12 }
 0x1cb   : > { %v2154_v63 = vadd.f32 %v2153_v34, %v2152_v60 }
 0x1cc   : > { %v1244_v39 = vadd.f32 %v2074_v62, %v3654_v20  ;;  %v2221_v26 = vpop.f32.mrb[64].mxu0 }
 0x1cd   : > { %v1464_v59 = vadd.f32 %v2221_v26, %v3660_v7  ;;  %v2233_v17 = vpop.f32.mrb[64].mxu1  ;;  %v1458_v30 = vpop.f32.mrb[65].mxu0 }
 0x1ce   : > { %v1504_v44 = vadd.f32 %v2233_v17, %v1359_v8  ;;  %v1459_v10 = vadd.f32 %v1458_v30, %v3657_v57  ;;  %v1498_v14 = vpop.f32.mrb[65].mxu1  ;;  %v1389_v20 = vadd.f32 %v2154_v63, %v1244_v39 }
 0x1cf   : > { %v1545_v46 = vmul.f32 %v3697_v9, %v1464_v59  ;;  %v1499_v3 = vadd.f32 %v1498_v14, %v1354_v16 }
 0x1d0   : > { %v1553_v15 = vmul.f32 %v3697_v9, %v1504_v44  ;;  %v1544_v7 = vmul.f32 %v3697_v9, %v1459_v10  ;;  %v2224_v27 = vpop.f32.mrb[66].mxu0 }
 0x1d1   : > { %v1568_v49 = vadd.f32 %v3703_v19, %v1545_v46  ;;  %v1552_v24 = vmul.f32 %v3697_v9, %v1499_v3  ;;  %v1474_v8 = vadd.f32 %v2224_v27, %v3666_v51  ;;  %v2236_v57 = vpop.f32.mrb[66].mxu1  ;;  %v1468_v1 = vpop.f32.mrb[67].mxu0 }
 0x1d2   : > { %v1576_v25 = vadd.f32 %v3703_v19, %v1553_v15  ;;  %v1567_v16 = vadd.f32 %v3703_v19, %v1544_v7  ;;  %v1514_v18 = vadd.f32 %v2236_v57, %v1369_v31  ;;  %v1469_v28 = vadd.f32 %v1468_v1, %v3663_v11  ;;  %v1508_v43 = vpop.f32.mrb[67].mxu1 }
 0x1d3   : > { %1584 = vst [vmem:[%s2697_s23 + $0x8] sm:$0xff] %v1568_v49  ;;  %v1575_v58 = vadd.f32 %v3703_v19, %v1552_v24  ;;  %v1547_v5 = vmul.f32 %v3697_v9, %v1474_v8  ;;  %v1509_v51 = vadd.f32 %v1508_v43, %v3683_v35 }
 0x1d4   : > { %1592 = vst [vmem:[%s2697_s23 + $0x48] sm:$0xff] %v1576_v25  ;;  %1583 = vst [vmem:[%s2697_s23] sm:$0xff] %v1567_v16  ;;  %v1555_v6 = vmul.f32 %v3697_v9, %v1514_v18  ;;  %v1546_v22 = vmul.f32 %v3697_v9, %v1469_v28  ;;  %v2227_v29 = vpop.f32.mrb[68].mxu0 }
 0x1d5   : > { %1591 = vst [vmem:[%s2697_s23 + $0x40] sm:$0xff] %v1575_v58  ;;  %v1570_v11 = vadd.f32 %v3703_v19, %v1547_v5  ;;  %v1554_v31 = vmul.f32 %v3697_v9, %v1509_v51  ;;  %v1484_v36 = vadd.f32 %v2227_v29, %v3672_v42  ;;  %v2239_v37 = vpop.f32.mrb[68].mxu1  ;;  %v1478_v4 = vpop.f32.mrb[69].mxu0 }
 0x1d6   : > { %v1578_v35 = vadd.f32 %v3703_v19, %v1555_v6  ;;  %v1569_v38 = vadd.f32 %v3703_v19, %v1546_v22  ;;  %v1524_v41 = vadd.f32 %v2239_v37, %v1379_v55  ;;  %v1479_v45 = vadd.f32 %v1478_v4, %v3669_v13  ;;  %v1518_v32 = vpop.f32.mrb[69].mxu1 }
 0x1d7   : > { %1586 = vst [vmem:[%s2697_s23 + $0x18] sm:$0xff] %v1570_v11  ;;  %v1577_v53 = vadd.f32 %v3703_v19, %v1554_v31  ;;  %v1549_v54 = vmul.f32 %v3697_v9, %v1484_v36  ;;  %v1519_v42 = vadd.f32 %v1518_v32, %v3687_v50 }
 0x1d8   : > { %1594 = vst [vmem:[%s2697_s23 + $0x58] sm:$0xff] %v1578_v35  ;;  %1585 = vst [vmem:[%s2697_s23 + $0x10] sm:$0xff] %v1569_v38  ;;  %v1557_v23 = vmul.f32 %v3697_v9, %v1524_v41  ;;  %v1548_v48 = vmul.f32 %v3697_v9, %v1479_v45  ;;  %v2230_v52 = vpop.f32.mrb[70].mxu0 }
 0x1d9   : > { %1593 = vst [vmem:[%s2697_s23 + $0x50] sm:$0xff] %v1577_v53  ;;  %v1572_v13 = vadd.f32 %v3703_v19, %v1549_v54  ;;  %v1556_v0 = vmul.f32 %v3697_v9, %v1519_v42  ;;  %v1494_v2 = vadd.f32 %v2230_v52, %v3678_v61  ;;  %v2242_v50 = vpop.f32.mrb[70].mxu1  ;;  %v1488_v55 = vpop.f32.mrb[71].mxu0 }
 0x1da   : > { %v1580_v56 = vadd.f32 %v3703_v19, %v1557_v23  ;;  %v1571_v12 = vadd.f32 %v3703_v19, %v1548_v48  ;;  %v1534_v47 = vadd.f32 %v2242_v50, %v1389_v20  ;;  %v1489_v60 = vadd.f32 %v1488_v55, %v3675_v40  ;;  %v1528_v21 = vpop.f32.mrb[71].mxu1 }
 0x1db   : > { %1588 = vst [vmem:[%s2697_s23 + $0x28] sm:$0xff] %v1572_v13  ;;  %v1579_v62 = vadd.f32 %v3703_v19, %v1556_v0  ;;  %v1551_v34 = vmul.f32 %v3697_v9, %v1494_v2  ;;  %v1529_v63 = vadd.f32 %v1528_v21, %v3691_v33 }
 0x1dc   : > { %1596 = vst [vmem:[%s2697_s23 + $0x68] sm:$0xff] %v1580_v56  ;;  %1587 = vst [vmem:[%s2697_s23 + $0x20] sm:$0xff] %v1571_v12  ;;  %v1559_v61 = vmul.f32 %v3697_v9, %v1534_v47  ;;  %v1550_v40 = vmul.f32 %v3697_v9, %v1489_v60 }
 0x1dd   : > { %1595 = vst [vmem:[%s2697_s23 + $0x60] sm:$0xff] %v1579_v62  ;;  %v1574_v39 = vadd.f32 %v3703_v19, %v1551_v34  ;;  %v1558_v26 = vmul.f32 %v3697_v9, %v1529_v63 }
 0x1de   : > { %v1582_v33 = vadd.f32 %v3703_v19, %v1559_v61  ;;  %v1573_v59 = vadd.f32 %v3703_v19, %v1550_v40 }
 0x1df   : > { %1590 = vst [vmem:[%s2697_s23 + $0x38] sm:$0xff] %v1574_v39  ;;  %v1581_v17 = vadd.f32 %v3703_v19, %v1558_v26 }
 0x1e0   : > { %1598 = vst [vmem:[%s2697_s23 + $0x78] sm:$0xff] %v1582_v33  ;;  %1589 = vst [vmem:[%s2697_s23 + $0x30] sm:$0xff] %v1573_v59 }
 0x1e1   : > { %1597 = vst [vmem:[%s2697_s23 + $0x70] sm:$0xff] %v1581_v17 }
 0x1e2   : > { %2505 = shalt.err (!%p2502_p10)
}
 0x1e3   : > { %s2506_s23 = scalar_lea.hbm %s3764_s10, 2048  ;;  %s2510_s27 = scalar_lea.hbm %s3831_s4, 8192 }
 0x1e4   : > { %p2507_p11 = scmp.ne.s32.totalorder %s3764_s10, %s2506_s23  ;;  %p2511_p0 = scmp.lt.u32.totalorder %s3764_s10, %s3831_s4 }
 0x1e5   : > { %p2512_p1 = scmp.lt.u32.totalorder %s2510_s27, %s2506_s23  ;;  %p2514_p4 = scmp.lt.u32.totalorder %s2506_s23, %s3764_s10 }
 0x1e6   : > { %p2508_p12 = pnand %p2507_p11, %p2669_p3 }
 0x1e7   : > { %p2513_p2 = por %p2512_p1, %p2511_p0 }
 0x1e8   : > { %p2509_p13 = pneg %p2508_p12 }
 0x1e9   : > { %p2515_p5 = por %p2514_p4, %p2513_p2 }
 0x1eb   : > { %p2516_p6 = pnand %p2515_p5, %p2509_p13 }
 0x1ed   : > { %2519 = shalt.err (!%p2516_p6)
}
 0x1ee   : > { %s2591_s0 = smov 128   ;;  %s2592_s6 = smov 8  }
 0x1ef   : > { %2419 = dma.vmem_to_hbm [thread:$0]  (%p2669_p3), %s3766_s5, 2048, %s3764_s10, %s3775_s9, %s2591_s0, %s2591_s0, %s2592_s6  }
 0x1f0 PF: > { %p2425_p7 = scmp.ge.s32.totalorder %s2588_s22, 2  ;;  %s1631_s11 = sand.u32 1, %s2560_s15  }
 0x1f1   : > { %s1632_s12 = scalar_lea.sflag [#allocation5], %s1631_s11 }
 0x1f2   : > { %p2422_p9 = pnand %p2425_p7, %p2678_p8 }
 0x1f4   : > { %2555 = dma.done.wait (!%p2422_p9), %s1632_s12, 2048  }
 0x1f5   : > { %2557 = vsyncadd (!%p2422_p9), %s1632_s12, 4294965248  ;;  %s17_s22 = sadd.s32 1, %s2588_s22   ;;  %s3839_s15 = smov %s2564_s16 }
 0x1f6   : > { %p14_p10 = scmp.ge.s32.totalorder %s17_s22, 6   ;;  %s3840_s16 = smov %s2568_s17 }
 0x1f7   : > { %s3841_s17 = smov %s2687_s7  ;;  %s3842_s18 = smov %s2580_s20 }
 0x1f8   : > { %s3843_s19 = smov %s2584_s21  ;;  %s3844_s20 = smov %s3847_s25 }
 0x1f9   : > { %s3845_s21 = smov %s3851_s26  ;;  %16 = sbr.rel (!%p14_p10) target bundleno = 7 (0x7), region = 183 }
 0x200   :  { %1637 = vsyncpa [#allocation5], 1 }
 0x201   :  { %1639 = vsyncpa [#allocation5 + $0x1], 1 }
 0x202   :  { %1640 = vsyncmov [#allocation3] }
 0x205   :  { %s1641_s28 = vpop.sfrf %1640 }
 0x206   :  { %p1832_p3 = scmp.ne.s32.totalorder %s1641_s28, 0 }
 0x208   :  { %1645 = shalt.err (%p1832_p3)  }
 0x209   :  { %1647 = vsyncmov [#allocation3 + $0x1] }
 0x20c   :  { %s1648_s29 = vpop.sfrf %1647 }
 0x20d   :  { %p1833_p8 = scmp.ne.s32.totalorder %s1648_s29, 0 }
 0x20f   :  { %1652 = shalt.err (%p1833_p8)  }

</bundles_post_ra>
